<compile_context>
chip_gen: v7x
topology: tpu7x:2x2x1
jax: 0.10.0
libtpu: 0.0.40
codegen_flags: <defaults>
</compile_context>

<pallas_src>
import functools

import jax
import jax.numpy as jnp
from jax.experimental import pallas as pl
from jax.experimental.pallas import tpu as pltpu

D_MAX = 100.0   # self.max in D_MLP
IN_F = 2        # input_features (uv concat t)
H = 32          # hidden width
OUT_F = 2       # layers[-1]
LANE = 128      # TPU vreg lane width
TILE_CAP = 8192  # max rows per grid step (~4-6 MiB live intermediates)


def _round_up(x, m):
    return ((x + m - 1) // m) * m


def _sigmoid(z_f32, act_dtype):
    """Sigmoid via tanh (one EUP transcendental per element).

    The tanh runs in `act_dtype` (bf16 by default: packed EUP path on
    v6e/v7x and half the vld/vst bytes for the (32, tile_n) intermediates).
    The result is returned as bf16 so it can feed the next MXU matmul
    directly.  Use act_dtype=jnp.float32 on v5e (no bf16 VPU/EUP there).
    """
    z = z_f32.astype(act_dtype)
    s = 0.5 * (1.0 + jnp.tanh(0.5 * z))
    return s.astype(jnp.bfloat16)


def _softplus(x):
    # Numerically stable softplus: log(1 + exp(x)), computed in f32.
    # TODO(synk): BINNs' softplus_relu output activation may additionally
    # clamp/threshold; plain softplus matches the docstring's
    # "softplus-activated, non-negative output".
    return jnp.maximum(x, 0.0) + jnp.log1p(jnp.exp(-jnp.abs(x)))


def d_mlp_kernel(x_ref, w1_ref, b1_ref, w2_ref, b2_ref, w3_ref, b3_ref,
                 w4_ref, b4_ref, out_ref, *, act_dtype):
    # x_ref: (IN_F, tile_n) feature-major input tile (row 0 = uv, row 1 = t).
    f0 = x_ref[0:1, :]                          # (1, tile_n)
    f1 = x_ref[1:2, :]                          # (1, tile_n)

    # Layer 1 (K=2): pure VPU broadcast mul+adds; skip the MXU entirely.
    w1 = w1_ref[...]                            # (H, IN_F) f32, PyTorch (out, in)
    z1 = w1[:, 0:1] * f0 + w1[:, 1:2] * f1 + b1_ref[...]     # (H, tile_n) f32
    h1 = _sigmoid(z1, act_dtype)                              # (H, tile_n) bf16

    # Layers 2-3: bf16 x bf16 MXU matmuls, f32 accumulation.
    h2 = _sigmoid(jnp.dot(w2_ref[...], h1,
                          preferred_element_type=jnp.float32) + b2_ref[...],
                  act_dtype)
    h3 = _sigmoid(jnp.dot(w3_ref[...], h2,
                          preferred_element_type=jnp.float32) + b3_ref[...],
                  act_dtype)

    # Output layer + softplus (f32) + scale.  (OUT_F, tile_n): lane-dense store.
    z = jnp.dot(w4_ref[...], h3,
                preferred_element_type=jnp.float32) + b4_ref[...]
    out_ref[...] = (D_MAX * _softplus(z)).astype(out_ref.dtype)


def _choose_tile_n(n):
    """Biggest lane-aligned batch tile, capped at TILE_CAP rows.

    Per grid step this kernel does only a few hundred cycles of real work, so
    the ~0.35us per-step overhead dominates at small tiles: use one grid step
    whenever N fits (optimal on single-TC v5e/v6e).  When N exceeds the cap,
    split into an even number of steps so both v7x TensorCores get equal work
    under "parallel" dimension semantics.  At tile_n=8192 the live
    intermediates plus double-buffered I/O are well inside the scoped-VMEM
    limit on every generation (including v7x's 64 MiB part).
    """
    n128 = _round_up(max(n, 1), LANE)
    if n128 <= TILE_CAP:
        return n128
    steps = pl.cdiv(n128, TILE_CAP)
    steps += steps & 1                      # even step count for v7x megacore
    return _round_up(pl.cdiv(n128, steps), LANE)


def d_mlp_forward(uv, t, params, *, tile_n=None, act_dtype=jnp.bfloat16):
    """uv: (N, 1) (or (N, 2) if t is None), t: (N, 1) or None -> D: (N, OUT_F)."""
    if t is None:
        assert uv.shape[1] == IN_F, f"expected {IN_F} input features"
        x = uv.astype(jnp.float32).T                            # (IN_F, N)
    else:
        # Single feature-major slab -> one input ref / DMA per grid step.
        x = jnp.concatenate(
            [uv.astype(jnp.float32).reshape(1, -1),
             t.astype(jnp.float32).reshape(1, -1)], axis=0)     # (IN_F, N)
    N = x.shape[1]

    if tile_n is None:
        tile_n = _choose_tile_n(N)
    # No wrapper-side padding: Pallas masks the partial final block; garbage
    # lanes never cross lanes so they cannot contaminate valid outputs.
    grid = (pl.cdiv(N, tile_n),)

    (w1, b1), (w2, b2), (w3, b3), (w4, b4) = params
    # Layers 2-4 go through the MXU: store their weights as bf16 (f32 MXU
    # operands take a multi-pass path).  Layer-1 weights stay f32 (VPU path).
    w2b, w3b, w4b = (w.astype(jnp.bfloat16) for w in (w2, w3, w4))

    def const(a):
        # Grid-invariant parameter block (~8 KB total): full-array block with a
        # constant index.  (pipeline_mode=pl.Buffered(1) would additionally
        # drop ~8 KB of redundant double-buffering; minor, deliberately omitted.)
        return pl.BlockSpec(a.shape, lambda i: (0, 0))

    out = pl.pallas_call(
        functools.partial(d_mlp_kernel, act_dtype=act_dtype),
        out_shape=jax.ShapeDtypeStruct((OUT_F, N), jnp.float32),
        grid_spec=pltpu.PrefetchScalarGridSpec(
            num_scalar_prefetch=0,
            grid=grid,
            in_specs=[
                pl.BlockSpec((IN_F, tile_n), lambda i: (0, i)),  # input tile
                const(w1), const(b1),                            # layer 1
                const(w2b), const(b2),                           # layer 2
                const(w3b), const(b3),                           # layer 3
                const(w4b), const(b4),                           # layer 4
            ],
            out_specs=pl.BlockSpec((OUT_F, tile_n), lambda i: (0, i)),
        ),
        compiler_params=pltpu.CompilerParams(
            dimension_semantics=("parallel",)),
    )(x, w1, b1, w2b, b2, w3b, b3, w4b, b4)

    # (OUT_F, N) -> (N, OUT_F) to match the PyTorch module's return layout.
    # Callers that can consume feature-major output should skip this transpose.
    return out.T


def init_params(key):
    """Deterministic synthetic parameters in PyTorch nn.Linear layout:
    weights (out, in), biases stored as (out, 1) column vectors."""
    dims = [(H, IN_F), (H, H), (H, H), (OUT_F, H)]
    params = []
    for fan_out, fan_in in dims:
        kw, kb, key = jax.random.split(key, 3)
        bound = 1.0 / jnp.sqrt(jnp.float32(fan_in))
        w = jax.random.uniform(kw, (fan_out, fan_in), jnp.float32, -bound, bound)
        b = jax.random.uniform(kb, (fan_out, 1), jnp.float32, -bound, bound)
        params.append((w, b))
    return params


def reference_forward(uv, t, params):
    x = uv if t is None else jnp.concatenate([uv, t], axis=1)
    (w1, b1), (w2, b2), (w3, b3), (w4, b4) = params
    h = jax.nn.sigmoid(x @ w1.T + b1.T)
    h = jax.nn.sigmoid(h @ w2.T + b2.T)
    h = jax.nn.sigmoid(h @ w3.T + b3.T)
    z = h @ w4.T + b4.T
    return D_MAX * jax.nn.softplus(z)


if __name__ == "__main__":
    key = jax.random.PRNGKey(0)
    k_uv, k_t, k_p = jax.random.split(key, 3)

    N = 1000   # not a multiple of 128: exercises the masked partial-block path
    uv = jax.random.uniform(k_uv, (N, 1), jnp.float32)   # predicted u values
    t = jax.random.uniform(k_t, (N, 1), jnp.float32)     # time values
    params = init_params(k_p)

    D = d_mlp_forward(uv, t, params)        # tile_n auto = 1024, grid = (1,)
    D = jax.block_until_ready(D)

    D_ref = reference_forward(uv, t, params)
    assert D.shape == (N, OUT_F), D.shape
    # bf16 MXU operands + bf16 tanh (with f32 accumulation) => relaxed
    # tolerance; output is scaled by 100, so the abs tolerance is generous
    # relative to the ~10-200 range of the outputs but far below any real bug.
    err = float(jnp.max(jnp.abs(D - D_ref)))
    assert jnp.allclose(D, D_ref, rtol=5e-2, atol=2.0), (
        f"mismatch vs reference, max abs err = {err}")

    print("KERNEL_OK")
</pallas_src>

<mosaic_0001>
module attributes {stable_mosaic.version = 11 : i64} {
  func.func @d_mlp_kernel(%arg0: i32, %arg1: memref<2x1024xf32, #tpu.memory_space<vmem>>, %arg2: memref<32x2xf32, #tpu.memory_space<vmem>>, %arg3: memref<32x1xf32, #tpu.memory_space<vmem>>, %arg4: memref<32x32xbf16, #tpu.memory_space<vmem>>, %arg5: memref<32x1xf32, #tpu.memory_space<vmem>>, %arg6: memref<32x32xbf16, #tpu.memory_space<vmem>>, %arg7: memref<32x1xf32, #tpu.memory_space<vmem>>, %arg8: memref<2x32xbf16, #tpu.memory_space<vmem>>, %arg9: memref<2x1xf32, #tpu.memory_space<vmem>>, %arg10: memref<2x1024xf32, #tpu.memory_space<vmem>>) attributes {dimension_semantics = [#tpu.dimension_semantics<parallel>], iteration_bounds = array<i64: 1>, scalar_prefetch = 0 : i64, scratch_operands = 0 : i64, tpu.core_type = #tpu.core_type<tc>, window_params = [{transform_indices = @transform_0, window_bounds = array<i64: 2, 1024>}, {pipeline_mode = #tpu.pipeline_mode<synchronous>, transform_indices = @transform_1, window_bounds = array<i64: 32, 2>}, {pipeline_mode = #tpu.pipeline_mode<synchronous>, transform_indices = @transform_2, window_bounds = array<i64: 32, 1>}, {pipeline_mode = #tpu.pipeline_mode<synchronous>, transform_indices = @transform_3, window_bounds = array<i64: 32, 32>}, {pipeline_mode = #tpu.pipeline_mode<synchronous>, transform_indices = @transform_4, window_bounds = array<i64: 32, 1>}, {pipeline_mode = #tpu.pipeline_mode<synchronous>, transform_indices = @transform_5, window_bounds = array<i64: 32, 32>}, {pipeline_mode = #tpu.pipeline_mode<synchronous>, transform_indices = @transform_6, window_bounds = array<i64: 32, 1>}, {pipeline_mode = #tpu.pipeline_mode<synchronous>, transform_indices = @transform_7, window_bounds = array<i64: 2, 32>}, {pipeline_mode = #tpu.pipeline_mode<synchronous>, transform_indices = @transform_8, window_bounds = array<i64: 2, 1>}, {transform_indices = @transform_9, window_bounds = array<i64: 2, 1024>}]} {
    %c0 = arith.constant 0 : index
    %c0_0 = arith.constant 0 : index
    %0 = vector.load %arg1[%c0, %c0_0] : memref<2x1024xf32, #tpu.memory_space<vmem>>, vector<1x1024xf32>
    %c1 = arith.constant 1 : index
    %c0_1 = arith.constant 0 : index
    %1 = vector.load %arg1[%c1, %c0_1] : memref<2x1024xf32, #tpu.memory_space<vmem>>, vector<1x1024xf32>
    %c0_2 = arith.constant 0 : index
    %c0_3 = arith.constant 0 : index
    %2 = vector.load %arg2[%c0_2, %c0_3] : memref<32x2xf32, #tpu.memory_space<vmem>>, vector<32x2xf32>
    %3 = vector.extract_strided_slice %2 {offsets = [0, 0], sizes = [32, 1], strides = [1, 1]} : vector<32x2xf32> to vector<32x1xf32>
    %4 = vector.broadcast %3 : vector<32x1xf32> to vector<32x1024xf32>
    %5 = vector.broadcast %0 : vector<1x1024xf32> to vector<32x1024xf32>
    %6 = arith.mulf %4, %5 : vector<32x1024xf32>
    %7 = vector.extract_strided_slice %2 {offsets = [0, 1], sizes = [32, 1], strides = [1, 1]} : vector<32x2xf32> to vector<32x1xf32>
    %8 = vector.broadcast %7 : vector<32x1xf32> to vector<32x1024xf32>
    %9 = vector.broadcast %1 : vector<1x1024xf32> to vector<32x1024xf32>
    %10 = arith.mulf %8, %9 : vector<32x1024xf32>
    %11 = arith.addf %6, %10 : vector<32x1024xf32>
    %c0_4 = arith.constant 0 : index
    %c0_5 = arith.constant 0 : index
    %12 = vector.load %arg3[%c0_4, %c0_5] : memref<32x1xf32, #tpu.memory_space<vmem>>, vector<32x1xf32>
    %13 = vector.broadcast %12 : vector<32x1xf32> to vector<32x1024xf32>
    %14 = arith.addf %11, %13 : vector<32x1024xf32>
    %15 = arith.truncf %14 : vector<32x1024xf32> to vector<32x1024xbf16>
    %cst = arith.constant 5.000000e-01 : bf16
    %16 = vector.broadcast %cst : bf16 to vector<32x1024xbf16>
    %17 = arith.mulf %16, %15 : vector<32x1024xbf16>
    %18 = math.tanh %17 : vector<32x1024xbf16>
    %cst_6 = arith.constant 1.000000e+00 : bf16
    %19 = vector.broadcast %cst_6 : bf16 to vector<32x1024xbf16>
    %20 = arith.addf %19, %18 : vector<32x1024xbf16>
    %cst_7 = arith.constant 5.000000e-01 : bf16
    %21 = vector.broadcast %cst_7 : bf16 to vector<32x1024xbf16>
    %22 = arith.mulf %21, %20 : vector<32x1024xbf16>
    %c0_8 = arith.constant 0 : index
    %c0_9 = arith.constant 0 : index
    %23 = vector.load %arg4[%c0_8, %c0_9] : memref<32x32xbf16, #tpu.memory_space<vmem>>, vector<32x32xbf16>
    %cst_10 = arith.constant dense<0.000000e+00> : vector<32x1024xf32>
    %24 = tpu.matmul %23, %22, %cst_10 {dimension_numbers = #tpu.dot_dimension_numbers<[1], [0], [0], [1], [0, 0, 1, 1], [], []>} : vector<32x32xbf16>, vector<32x1024xbf16>, vector<32x1024xf32> -> vector<32x1024xf32>
    %c0_11 = arith.constant 0 : index
    %c0_12 = arith.constant 0 : index
    %25 = vector.load %arg5[%c0_11, %c0_12] : memref<32x1xf32, #tpu.memory_space<vmem>>, vector<32x1xf32>
    %26 = vector.broadcast %25 : vector<32x1xf32> to vector<32x1024xf32>
    %27 = arith.addf %24, %26 : vector<32x1024xf32>
    %28 = arith.truncf %27 : vector<32x1024xf32> to vector<32x1024xbf16>
    %cst_13 = arith.constant 5.000000e-01 : bf16
    %29 = vector.broadcast %cst_13 : bf16 to vector<32x1024xbf16>
    %30 = arith.mulf %29, %28 : vector<32x1024xbf16>
    %31 = math.tanh %30 : vector<32x1024xbf16>
    %cst_14 = arith.constant 1.000000e+00 : bf16
    %32 = vector.broadcast %cst_14 : bf16 to vector<32x1024xbf16>
    %33 = arith.addf %32, %31 : vector<32x1024xbf16>
    %cst_15 = arith.constant 5.000000e-01 : bf16
    %34 = vector.broadcast %cst_15 : bf16 to vector<32x1024xbf16>
    %35 = arith.mulf %34, %33 : vector<32x1024xbf16>
    %c0_16 = arith.constant 0 : index
    %c0_17 = arith.constant 0 : index
    %36 = vector.load %arg6[%c0_16, %c0_17] : memref<32x32xbf16, #tpu.memory_space<vmem>>, vector<32x32xbf16>
    %cst_18 = arith.constant dense<0.000000e+00> : vector<32x1024xf32>
    %37 = tpu.matmul %36, %35, %cst_18 {dimension_numbers = #tpu.dot_dimension_numbers<[1], [0], [0], [1], [0, 0, 1, 1], [], []>} : vector<32x32xbf16>, vector<32x1024xbf16>, vector<32x1024xf32> -> vector<32x1024xf32>
    %c0_19 = arith.constant 0 : index
    %c0_20 = arith.constant 0 : index
    %38 = vector.load %arg7[%c0_19, %c0_20] : memref<32x1xf32, #tpu.memory_space<vmem>>, vector<32x1xf32>
    %39 = vector.broadcast %38 : vector<32x1xf32> to vector<32x1024xf32>
    %40 = arith.addf %37, %39 : vector<32x1024xf32>
    %41 = arith.truncf %40 : vector<32x1024xf32> to vector<32x1024xbf16>
    %cst_21 = arith.constant 5.000000e-01 : bf16
    %42 = vector.broadcast %cst_21 : bf16 to vector<32x1024xbf16>
    %43 = arith.mulf %42, %41 : vector<32x1024xbf16>
    %44 = math.tanh %43 : vector<32x1024xbf16>
    %cst_22 = arith.constant 1.000000e+00 : bf16
    %45 = vector.broadcast %cst_22 : bf16 to vector<32x1024xbf16>
    %46 = arith.addf %45, %44 : vector<32x1024xbf16>
    %cst_23 = arith.constant 5.000000e-01 : bf16
    %47 = vector.broadcast %cst_23 : bf16 to vector<32x1024xbf16>
    %48 = arith.mulf %47, %46 : vector<32x1024xbf16>
    %c0_24 = arith.constant 0 : index
    %c0_25 = arith.constant 0 : index
    %49 = vector.load %arg8[%c0_24, %c0_25] : memref<2x32xbf16, #tpu.memory_space<vmem>>, vector<2x32xbf16>
    %cst_26 = arith.constant dense<0.000000e+00> : vector<2x1024xf32>
    %50 = tpu.matmul %49, %48, %cst_26 {dimension_numbers = #tpu.dot_dimension_numbers<[1], [0], [0], [1], [0, 0, 1, 1], [], []>} : vector<2x32xbf16>, vector<32x1024xbf16>, vector<2x1024xf32> -> vector<2x1024xf32>
    %c0_27 = arith.constant 0 : index
    %c0_28 = arith.constant 0 : index
    %51 = vector.load %arg9[%c0_27, %c0_28] : memref<2x1xf32, #tpu.memory_space<vmem>>, vector<2x1xf32>
    %52 = vector.broadcast %51 : vector<2x1xf32> to vector<2x1024xf32>
    %53 = arith.addf %50, %52 : vector<2x1024xf32>
    %cst_29 = arith.constant 0.000000e+00 : f32
    %54 = vector.broadcast %cst_29 : f32 to vector<2x1024xf32>
    %55 = arith.maximumf %53, %54 : vector<2x1024xf32>
    %56 = math.absf %53 : vector<2x1024xf32>
    %cst_30 = arith.constant 0.000000e+00 : f32
    %57 = vector.broadcast %cst_30 : f32 to vector<2x1024xf32>
    %58 = arith.subf %57, %56 : vector<2x1024xf32>
    %59 = math.exp %58 : vector<2x1024xf32>
    %60 = math.log1p %59 : vector<2x1024xf32>
    %61 = arith.addf %55, %60 : vector<2x1024xf32>
    %cst_31 = arith.constant 1.000000e+02 : f32
    %62 = vector.broadcast %cst_31 : f32 to vector<2x1024xf32>
    %63 = arith.mulf %62, %61 : vector<2x1024xf32>
    %c0_32 = arith.constant 0 : index
    %c0_33 = arith.constant 0 : index
    %64 = vector.load %arg10[%c0_32, %c0_33] : memref<2x1024xf32, #tpu.memory_space<vmem>>, vector<2x1024xf32>
    tpu.vector_store %arg10[%c0_32, %c0_33], %63 {strides = array<i32>} : memref<2x1024xf32, #tpu.memory_space<vmem>>, vector<2x1024xf32>,
    return
  }
  func.func @transform_0(%arg0: i32) -> (i32, i32) {
    %c0_i32 = arith.constant 0 : i32
    %c0_i32_0 = arith.constant 0 : i32
    return %c0_i32, %arg0 : i32, i32
  }
  func.func @transform_1(%arg0: i32) -> (i32, i32) {
    %c0_i32 = arith.constant 0 : i32
    %c0_i32_0 = arith.constant 0 : i32
    %c0_i32_1 = arith.constant 0 : i32
    return %c0_i32, %c0_i32_0 : i32, i32
  }
  func.func @transform_2(%arg0: i32) -> (i32, i32) {
    %c0_i32 = arith.constant 0 : i32
    %c0_i32_0 = arith.constant 0 : i32
    %c0_i32_1 = arith.constant 0 : i32
    return %c0_i32, %c0_i32_0 : i32, i32
  }
  func.func @transform_3(%arg0: i32) -> (i32, i32) {
    %c0_i32 = arith.constant 0 : i32
    %c0_i32_0 = arith.constant 0 : i32
    %c0_i32_1 = arith.constant 0 : i32
    return %c0_i32, %c0_i32_0 : i32, i32
  }
  func.func @transform_4(%arg0: i32) -> (i32, i32) {
    %c0_i32 = arith.constant 0 : i32
    %c0_i32_0 = arith.constant 0 : i32
    %c0_i32_1 = arith.constant 0 : i32
    return %c0_i32, %c0_i32_0 : i32, i32
  }
  func.func @transform_5(%arg0: i32) -> (i32, i32) {
    %c0_i32 = arith.constant 0 : i32
    %c0_i32_0 = arith.constant 0 : i32
    %c0_i32_1 = arith.constant 0 : i32
    return %c0_i32, %c0_i32_0 : i32, i32
  }
  func.func @transform_6(%arg0: i32) -> (i32, i32) {
    %c0_i32 = arith.constant 0 : i32
    %c0_i32_0 = arith.constant 0 : i32
    %c0_i32_1 = arith.constant 0 : i32
    return %c0_i32, %c0_i32_0 : i32, i32
  }
  func.func @transform_7(%arg0: i32) -> (i32, i32) {
    %c0_i32 = arith.constant 0 : i32
    %c0_i32_0 = arith.constant 0 : i32
    %c0_i32_1 = arith.constant 0 : i32
    return %c0_i32, %c0_i32_0 : i32, i32
  }
  func.func @transform_8(%arg0: i32) -> (i32, i32) {
    %c0_i32 = arith.constant 0 : i32
    %c0_i32_0 = arith.constant 0 : i32
    %c0_i32_1 = arith.constant 0 : i32
    return %c0_i32, %c0_i32_0 : i32, i32
  }
  func.func @transform_9(%arg0: i32) -> (i32, i32) {
    %c0_i32 = arith.constant 0 : i32
    %c0_i32_0 = arith.constant 0 : i32
    return %c0_i32, %arg0 : i32, i32
  }
}

</mosaic_0001>

<bundles_post_ra>
// kernel: tpu_custom_call.1
= control target key start
LH: loop header
LB: loop body
LE: loop exit
PB: predicated region body
PF: predicated region fallthrough
CT: control target
= control target key end

     0   :  { %v1619_v2 = vmov 1   ;;  %v2144_v4 = vmov 0   ;;  %s2134_s0 = inlined_call_operand.vmem [shape: f32[2,1000], index: 0, kind: input, shape index: {}]   ;;  %s2135_s1 = inlined_call_operand.vmem [shape: f32[32,2], index: 1, kind: input, shape index: {}]   ;;  %s2136_s2 = inlined_call_operand.vmem [shape: f32[32,1], index: 2, kind: input, shape index: {}]   ;;  %s2137_s3 = inlined_call_operand.vmem [shape: bf16[32,32], index: 3, kind: input, shape index: {}]   ;;  %s2138_s4 = inlined_call_operand.vmem [shape: f32[32,1], index: 4, kind: input, shape index: {}]   ;;  %s2139_s5 = inlined_call_operand.vmem [shape: bf16[32,32], index: 5, kind: input, shape index: {}]   ;;  %s2140_s6 = inlined_call_operand.vmem [shape: f32[32,1], index: 6, kind: input, shape index: {}]   ;;  %s2141_s7 = inlined_call_operand.vmem [shape: bf16[2,32], index: 7, kind: input, shape index: {}]   ;;  %s2142_s8 = inlined_call_operand.vmem [shape: f32[2,1], index: 8, kind: input, shape index: {}]   ;;  %s2143_s9 = inlined_call_operand.hbm [shape: f32[2,1000], index: 9, kind: output, shape index: {}]  }
   0x1   :  { %v41_v0 = vld [vmem:[%s2135_s1 + $0x10] sm:$0xff]  ;;  %v39_v1 = vld [vmem:[%s2135_s1] sm:$0xff]  ;;  %1459 = vset.pattern.permute.xlu0 %v1619_v2  ;;  %1457 = vset.pattern.permute.xlu1 %v1619_v2  ;;  %v40_v3 = vld [vmem:[%s2135_s1 + $0x8] sm:$0xff] }
   0x2   :  { %145 = vperm.xlu0 %1459, %v41_v0   ;;  %137 = vperm.xlu1 %1457, %v39_v1   ;;  %v42_v5 = vld [vmem:[%s2135_s1 + $0x18] sm:$0xff] }
   0x3   :  { %470 = vmatprep.mubr.bf16.mxu0 %v2144_v4  ;;  %523 = vmatprep.mubr.bf16.mxu1 %v2144_v4 }
   0x6   :  { %1460 = vset.pattern.permute.xlu0 %v2144_v4  ;;  %141 = vperm.xlu1 %1457, %v40_v3  }
   0x7   :  { %45 = vperm.xlu0 %1460, %v39_v1  }
   0x8   :  { %14 = vsyncpa [#allocation3], 0  ;;  %v258_v6 = vld [vmem:[%s2136_s2 + $0x8] sm:$0xff]  ;;  %v257_v7 = vld [vmem:[%s2136_s2] sm:$0xff]  ;;  %v64_v19 = vlaneseq  ;;  %vm431_vm0 = vcmask 261120  }
   0x9   :  { %v397_v8 = vld [vmem:[%s2138_s4] sm:$0xff]  ;;  %v259_v9 = vld [vmem:[%s2136_s2 + $0x10] sm:$0xff]  ;;  %v260_v11 = vld [vmem:[%s2136_s2 + $0x18] sm:$0xff] }
   0xa   :  { %1458 = vset.pattern.permute.xlu1 %v2144_v4  ;;  %v399_v10 = vld [vmem:[%s2138_s4 + $0x10] sm:$0xff]  ;;  %v734_v12 = vld [vmem:[%s2140_s6] sm:$0xff]  ;;  %v398_v13 = vld [vmem:[%s2138_s4 + $0x8] sm:$0xff]  ;;  %v1729_v20 = vshrl.u32 %v64_v19, 7 }
   0xb   :  { %50 = vperm.xlu0 %1460, %v40_v3   ;;  %60 = vperm.xlu1 %1458, %v42_v5   ;;  %v736_v14 = vld [vmem:[%s2140_s6 + $0x10] sm:$0xff]  ;;  %v400_v15 = vld [vmem:[%s2138_s4 + $0x18] sm:$0xff]  ;;  %v1067_v16 = vld [vmem:[%s2142_s8] sm:$0x3] }
   0xc   :  { %v735_v17 = vld [vmem:[%s2140_s6 + $0x8] sm:$0xff]  ;;  %v737_v18 = vld [vmem:[%s2140_s6 + $0x18] sm:$0xff]  ;;  %2149 = vst [vmem:[#allocation5_spill] sm:$0xff] %v1729_v20  ;;  %v70_v21 = vsub.s32 1, %v1729_v20  ;;  %v78_v22 = vsub.s32 3, %v1729_v20  ;;  %v66_v24 = vsub.s32 0, %v1729_v20 }
   0xd   :  { %v1428_v23 = vld [vmem:[%s2134_s0 + $0x1] ss:$2 sm:$0xff]  ;;  %v74_v25 = vsub.s32 2, %v1729_v20  ;;  %v36_v26 = vld [vmem:[%s2134_s0] ss:$2 sm:$0xff]  ;;  %v86_v27 = vsub.s32 5, %v1729_v20 }
   0xe   :  { %v94_v28 = vsub.s32 7, %v1729_v20  ;;  %v82_v29 = vsub.s32 4, %v1729_v20  ;;  %v90_v30 = vsub.s32 6, %v1729_v20  ;;  %v1745_v31 = vrot.slane %v1428_v23, %v70_v21 }
   0xf   :  { %55 = vperm.xlu0 %1460, %v41_v0   ;;  %1461 = vset.pattern.permute.xlu1 %v1619_v2  ;;  %v1747_v32 = vrot.slane %v1428_v23, %v78_v22  ;;  %v1749_v33 = vrot.slane %v36_v26, %v70_v21  ;;  %v1751_v34 = vrot.slane %v36_v26, %v78_v22 }
  0x10   :  { %149 = vperm.xlu1 %1461, %v42_v5   ;;  %v1753_v35 = vrot.slane %v1428_v23, %v66_v24  ;;  %v1755_v36 = vrot.slane %v1428_v23, %v74_v25  ;;  %v1757_v37 = vrot.slane %v36_v26, %v66_v24  ;;  %v1759_v38 = vrot.slane %v36_v26, %v74_v25 }
  0x11   :  { %v1761_v39 = vrot.slane %v1428_v23, %v86_v27  ;;  %v1763_v40 = vrot.slane %v1428_v23, %v94_v28  ;;  %v1767_v43 = vrot.slane %v36_v26, %v86_v27  ;;  %v1769_v44 = vrot.slane %v36_v26, %v94_v28 }
  0x12   :  { %v1771_v45 = vrot.slane %v1428_v23, %v82_v29  ;;  %v1773_v46 = vrot.slane %v1428_v23, %v90_v30  ;;  %v1777_v49 = vrot.slane %v36_v26, %v82_v29  ;;  %v1779_v50 = vrot.slane %v36_v26, %v90_v30 }
  0x13   :  { %268 = vperm.xlu0 %1460, %v258_v6  }
  0x14   :  { %1462 = vset.pattern.permute.xlu1 %v2144_v4  ;;  %2150 = vst [vmem:[#allocation6_spill] sm:$0xff] %v1771_v45 }
  0x15   :  { %263 = vperm.xlu1 %1462, %v257_v7  }
  0x17   :  { %403 = vperm.xlu0 %1460, %v397_v8  }
  0x19   :  { %273 = vperm.xlu1 %1462, %v259_v9  }
  0x1b   :  { %413 = vperm.xlu0 %1460, %v399_v10  }
  0x1d   :  { %278 = vperm.xlu1 %1462, %v260_v11  }
  0x1f   :  { %740 = vperm.xlu0 %1460, %v734_v12  }
  0x21   :  { %408 = vperm.xlu1 %1462, %v398_v13  }
  0x23   :  { %750 = vperm.xlu0 %1460, %v736_v14  }
  0x25   :  { %418 = vperm.xlu1 %1462, %v400_v15  }
  0x27   :  { %1070 = vperm.xlu0 %1460, %v1067_v16  }
  0x29   :  { %745 = vperm.xlu1 %1462, %v735_v17  }
  0x2d   :  { %755 = vperm.xlu1 %1462, %v737_v18  }
  0x81   :  { %v138_v41 = vpop.permute.xlu1 %137  ;;  %v1765_v42 = vpop.permute.xlu0 %145 }
  0x82   :  { %v194_v47 = vmul.f32 %v1745_v31, %v138_v41  ;;  %v196_v48 = vmul.f32 %v1747_v32, %v138_v41  ;;  %v193_v51 = vmul.f32 %v1753_v35, %v138_v41  ;;  %v195_v52 = vmul.f32 %v1755_v36, %v138_v41 }
  0x83   :  { %v210_v53 = vmul.f32 %v1745_v31, %v1765_v42  ;;  %v212_v54 = vmul.f32 %v1747_v32, %v1765_v42  ;;  %v209_v55 = vmul.f32 %v1753_v35, %v1765_v42  ;;  %v211_v56 = vmul.f32 %v1755_v36, %v1765_v42 }
  0x84   :  { %v198_v57 = vmul.f32 %v1761_v39, %v138_v41  ;;  %v200_v58 = vmul.f32 %v1763_v40, %v138_v41  ;;  %v197_v60 = vmul.f32 %v1771_v45, %v138_v41  ;;  %v1797_v61 = vmul.f32 %v1773_v46, %v138_v41 }
  0x85   :  { %v1793_v59 = vpop.permute.xlu1 %141  ;;  %v1801_v62 = vmul.f32 %v1761_v39, %v1765_v42  ;;  %v1805_v63 = vmul.f32 %v1763_v40, %v1765_v42 }
  0x86   :  { %v1807_v0 = vpop.permute.xlu0 %45  ;;  %v202_v1 = vmul.f32 %v1745_v31, %v1793_v59  ;;  %v204_v2 = vmul.f32 %v1747_v32, %v1793_v59  ;;  %v201_v3 = vmul.f32 %v1753_v35, %v1793_v59  ;;  %v203_v5 = vmul.f32 %v1755_v36, %v1793_v59 }
  0x87   :  { %2151 = vst [vmem:[#allocation7_spill] sm:$0xff] %v1805_v63  ;;  %v105_v6 = vmul.f32 %v1749_v33, %v1807_v0  ;;  %v107_v7 = vmul.f32 %v1751_v34, %v1807_v0  ;;  %v104_v8 = vmul.f32 %v1757_v37, %v1807_v0  ;;  %v106_v9 = vmul.f32 %v1759_v38, %v1807_v0 }
  0x88   :  { %v109_v10 = vmul.f32 %v1767_v43, %v1807_v0  ;;  %v206_v11 = vmul.f32 %v1761_v39, %v1793_v59  ;;  %v111_v12 = vmul.f32 %v1769_v44, %v1807_v0  ;;  %v208_v13 = vmul.f32 %v1763_v40, %v1793_v59 }
  0x89   :  { %v226_v14 = vadd.f32 %v194_v47, %v105_v6  ;;  %v228_v15 = vadd.f32 %v196_v48, %v107_v7  ;;  %v225_v16 = vadd.f32 %v193_v51, %v104_v8  ;;  %v227_v17 = vadd.f32 %v195_v52, %v106_v9 }
  0x8a   :  { %v1833_v18 = vpop.permute.xlu0 %50  ;;  %v1835_v19 = vpop.permute.xlu1 %60  ;;  %v230_v21 = vadd.f32 %v198_v57, %v109_v10  ;;  %v232_v22 = vadd.f32 %v200_v58, %v111_v12  ;;  %v108_v23 = vmul.f32 %v1777_v49, %v1807_v0  ;;  %v205_v24 = vmul.f32 %v1771_v45, %v1793_v59 }
  0x8b   :  { %v113_v25 = vmul.f32 %v1749_v33, %v1833_v18  ;;  %v115_v26 = vmul.f32 %v1751_v34, %v1833_v18  ;;  %v112_v27 = vmul.f32 %v1757_v37, %v1833_v18  ;;  %v114_v28 = vmul.f32 %v1759_v38, %v1833_v18 }
  0x8c   :  { %v129_v29 = vmul.f32 %v1749_v33, %v1835_v19  ;;  %v131_v30 = vmul.f32 %v1751_v34, %v1835_v19  ;;  %v128_v41 = vmul.f32 %v1757_v37, %v1835_v19  ;;  %v130_v47 = vmul.f32 %v1759_v38, %v1835_v19 }
  0x8d   :  { %v234_v48 = vadd.f32 %v202_v1, %v113_v25  ;;  %v236_v51 = vadd.f32 %v204_v2, %v115_v26  ;;  %v233_v52 = vadd.f32 %v201_v3, %v112_v27  ;;  %v235_v57 = vadd.f32 %v203_v5, %v114_v28 }
  0x8e   :  { %v1857_v58 = vpop.permute.xlu0 %55  ;;  %v117_v6 = vmul.f32 %v1767_v43, %v1833_v18  ;;  %v119_v7 = vmul.f32 %v1769_v44, %v1833_v18  ;;  %v116_v8 = vmul.f32 %v1777_v49, %v1833_v18  ;;  %v229_v9 = vadd.f32 %v197_v60, %v108_v23 }
  0x8f   :  { %v1865_v10 = vpop.permute.xlu1 %149  ;;  %v121_v1 = vmul.f32 %v1749_v33, %v1857_v58  ;;  %v123_v2 = vmul.f32 %v1751_v34, %v1857_v58  ;;  %v120_v3 = vmul.f32 %v1757_v37, %v1857_v58  ;;  %v122_v5 = vmul.f32 %v1759_v38, %v1857_v58 }
  0x90   :  { %v218_v12 = vmul.f32 %v1745_v31, %v1865_v10  ;;  %v220_v60 = vmul.f32 %v1747_v32, %v1865_v10  ;;  %v217_v23 = vmul.f32 %v1753_v35, %v1865_v10  ;;  %v219_v33 = vmul.f32 %v1755_v36, %v1865_v10 }
  0x91   :  { %v242_v25 = vadd.f32 %v210_v53, %v121_v1  ;;  %v244_v34 = vadd.f32 %v212_v54, %v123_v2  ;;  %v241_v26 = vadd.f32 %v209_v55, %v120_v3  ;;  %v243_v27 = vadd.f32 %v211_v56, %v122_v5 }
  0x92   :  { %v1883_v37 = vpop.permute.xlu0 %268  ;;  %v250_v28 = vadd.f32 %v218_v12, %v129_v29  ;;  %v252_v38 = vadd.f32 %v220_v60, %v131_v30  ;;  %v249_v4 = vadd.f32 %v217_v23, %v128_v41  ;;  %v251_v20 = vadd.f32 %v219_v33, %v130_v47 }
  0x93   :  { %v290_v31 = vadd.f32 %v1883_v37, %v234_v48  ;;  %v292_v32 = vadd.f32 %v1883_v37, %v236_v51  ;;  %v289_v63 = vadd.f32 %v1883_v37, %v233_v52  ;;  %v291_v35 = vadd.f32 %v1883_v37, %v235_v57 }
  0x94   :  { %v264_v45 = vpop.permute.xlu1 %263  ;;  %v238_v36 = vadd.f32 %v206_v11, %v117_v6  ;;  %v240_v53 = vadd.f32 %v208_v13, %v119_v7  ;;  %v237_v54 = vadd.f32 %v205_v24, %v116_v8  ;;  %v110_v55 = vmul.f32 %v1779_v50, %v1807_v0 }
  0x95   :  { %v282_v56 = vadd.f32 %v264_v45, %v226_v14  ;;  %v284_v29 = vadd.f32 %v264_v45, %v228_v15  ;;  %v281_v30 = vadd.f32 %v264_v45, %v225_v16  ;;  %v283_v41 = vadd.f32 %v264_v45, %v227_v17 }
  0x96   :  { %v286_v47 = vadd.f32 %v264_v45, %v230_v21  ;;  %v294_v48 = vadd.f32 %v1883_v37, %v238_v36  ;;  %v288_v1 = vadd.f32 %v264_v45, %v232_v22  ;;  %v296_v51 = vadd.f32 %v1883_v37, %v240_v53 }
  0x97   :  { %v314_v52 = vpack.c.bf16 %v290_v31, %v282_v56  ;;  %v316_v2 = vpack.c.bf16 %v292_v32, %v284_v29  ;;  %v313_v57 = vpack.c.bf16 %v289_v63, %v281_v30  ;;  %v315_v3 = vpack.c.bf16 %v291_v35, %v283_v41 }
  0x98   :  { %v1893_v11 = vpop.permute.xlu1 %273  ;;  %v318_v13 = vpack.c.bf16 %v294_v48, %v286_v47  ;;  %v320_v24 = vpack.c.bf16 %v296_v51, %v288_v1  ;;  %v285_v6 = vadd.f32 %v264_v45, %v229_v9  ;;  %v293_v0 = vadd.f32 %v1883_v37, %v237_v54 }
  0x99   :  { %v330_v14 = vmul.bf16 1056980736, %v314_v52  ;;  %v332_v15 = vmul.bf16 1056980736, %v316_v2  ;;  %v329_v16 = vmul.bf16 1056980736, %v313_v57  ;;  %v298_v17 = vadd.f32 %v1893_v11, %v242_v25 }
  0x9a   :  { %v331_v21 = vmul.bf16 1056980736, %v315_v3  ;;  %v300_v22 = vadd.f32 %v1893_v11, %v244_v34  ;;  %v297_v7 = vadd.f32 %v1893_v11, %v241_v26  ;;  %v299_v63 = vadd.f32 %v1893_v11, %v243_v27 }
  0x9b   :  { %1467 = vtanh.bf16 %v330_v14  ;;  %v334_v8 = vmul.bf16 1056980736, %v318_v13  ;;  %v336_v5 = vmul.bf16 1056980736, %v320_v24  ;;  %v317_v12 = vpack.c.bf16 %v293_v0, %v285_v6 }
  0x9c   :  { %v1900_v60 = vpop.permute.xlu1 %278  ;;  %1469 = vtanh.bf16 %v332_v15  ;;  %v118_v9 = vmul.f32 %v1779_v50, %v1833_v18  ;;  %v207_v23 = vmul.f32 %v1773_v46, %v1793_v59  ;;  %v231_v33 = vadd.f32 %v1797_v61, %v110_v55 }
  0x9d   :  { %1471 = vtanh.bf16 %v329_v16  ;;  %v306_v25 = vadd.f32 %v1900_v60, %v250_v28  ;;  %v308_v34 = vadd.f32 %v1900_v60, %v252_v38  ;;  %v305_v26 = vadd.f32 %v1900_v60, %v249_v4 }
  0x9e   :  { %1473 = vtanh.bf16 %v331_v21  ;;  %v307_v27 = vadd.f32 %v1900_v60, %v251_v20  ;;  %v333_v31 = vmul.bf16 1056980736, %v317_v12  ;;  %v239_v32 = vadd.f32 %v207_v23, %v118_v9 }
  0x9f   :  { %v322_v35 = vpack.c.bf16 %v306_v25, %v298_v17  ;;  %v324_v36 = vpack.c.bf16 %v308_v34, %v300_v22  ;;  %v321_v18 = vpack.c.bf16 %v305_v26, %v297_v7  ;;  %1475 = vtanh.bf16 %v334_v8 }
  0xa0   :  { %v323_v53 = vpack.c.bf16 %v307_v27, %v299_v63  ;;  %1477 = vtanh.bf16 %v336_v5  ;;  %v287_v59 = vadd.f32 %v264_v45, %v231_v33  ;;  %v295_v61 = vadd.f32 %v1883_v37, %v239_v32 }
  0xa1   :  { %v338_v54 = vmul.bf16 1056980736, %v322_v35  ;;  %v340_v28 = vmul.bf16 1056980736, %v324_v36  ;;  %v337_v55 = vmul.bf16 1056980736, %v321_v18  ;;  %1479 = vtanh.bf16 %v333_v31 }
  0xa2   :  { %v339_v38 = vmul.bf16 1056980736, %v323_v53  ;;  %v319_v4 = vpack.c.bf16 %v295_v61, %v287_v59  ;;  %v125_v20 = vmul.f32 %v1767_v43, %v1857_v58  ;;  %v133_v56 = vmul.f32 %v1767_v43, %v1835_v19 }
  0xa3   :  { %1481 = vtanh.bf16 %v338_v54  ;;  %v222_v29 = vmul.f32 %v1761_v39, %v1865_v10  ;;  %v127_v45 = vmul.f32 %v1769_v44, %v1857_v58  ;;  %v135_v37 = vmul.f32 %v1769_v44, %v1835_v19  ;;  %v2152_v39 = vld [vmem:[#allocation6_spill] sm:$0xff]  ;;  %v2153_v44 = vld [vmem:[#allocation7_spill] sm:$0xff] }
  0xa4   :  { %1483 = vtanh.bf16 %v340_v28  ;;  %v335_v30 = vmul.bf16 1056980736, %v319_v4  ;;  %v246_v41 = vadd.f32 %v1801_v62, %v125_v20  ;;  %v224_v47 = vmul.f32 %v1763_v40, %v1865_v10 }
  0xa5   :  { %1485 = vtanh.bf16 %v337_v55  ;;  %v254_v48 = vadd.f32 %v222_v29, %v133_v56  ;;  %v124_v43 = vmul.f32 %v1777_v49, %v1857_v58  ;;  %v213_v1 = vmul.f32 %v2152_v39, %v1765_v42 }
  0xa6   :  { %v1468_v51 = vpop.eup %1467  ;;  %1487 = vtanh.bf16 %v339_v38  ;;  %v302_v52 = vadd.f32 %v1893_v11, %v246_v41  ;;  %v248_v2 = vadd.f32 %v2153_v44, %v127_v45  ;;  %v256_v57 = vadd.f32 %v224_v47, %v135_v37 }
  0xa7   :  { %v1470_v3 = vpop.eup %1469  ;;  %v362_v62 = vadd.bf16 1065369472, %v1468_v51  ;;  %1489 = vtanh.bf16 %v335_v30  ;;  %v310_v40 = vadd.f32 %v1900_v60, %v254_v48  ;;  %v132_v13 = vmul.f32 %v1777_v49, %v1835_v19 }
  0xa8   :  { %v1472_v24 = vpop.eup %1471  ;;  %v364_v6 = vadd.bf16 1065369472, %v1470_v3  ;;  %v304_v0 = vadd.f32 %v1893_v11, %v248_v2  ;;  %v312_v14 = vadd.f32 %v1900_v60, %v256_v57  ;;  %v221_v15 = vmul.f32 %v2152_v39, %v1865_v10 }
  0xa9   :  { %v1474_v16 = vpop.eup %1473  ;;  %v378_v17 = vmul.bf16 1056980736, %v362_v62  ;;  %v361_v21 = vadd.bf16 1065369472, %v1472_v24  ;;  %v326_v22 = vpack.c.bf16 %v310_v40, %v302_v52  ;;  %v245_v7 = vadd.f32 %v213_v1, %v124_v43  ;;  %v1464_v24 = vld [vmem:[%s2137_s3 + $0x8] sm:$0xff]  }
  0xaa   :  { %v1476_v63 = vpop.eup %1475  ;;  %v380_v8 = vmul.bf16 1056980736, %v364_v6  ;;  %v363_v5 = vadd.bf16 1065369472, %v1474_v16  ;;  %v328_v12 = vpack.c.bf16 %v312_v14, %v304_v0  ;;  %v253_v9 = vadd.f32 %v221_v15, %v132_v13 }
  0xab   :  { %v1478_v49 = vpop.eup %1477  ;;  %438 = vmatprep.subr.bf16.mxu0 %v378_v17  ;;  %v377_v23 = vmul.bf16 1056980736, %v361_v21  ;;  %v342_v33 = vmul.bf16 1056980736, %v326_v22  ;;  %v126_v25 = vmul.f32 %v1779_v50, %v1857_v58  ;;  %v301_v31 = vadd.f32 %v1893_v11, %v245_v7  ;;  %v1972_v21 = vpop.permute.xlu0 %403 }
  0xac   :  { %v1480_v34 = vpop.eup %1479  ;;  %491 = vmatprep.subr.bf16.mxu1 %v380_v8  ;;  %v379_v26 = vmul.bf16 1056980736, %v363_v5  ;;  %v344_v27 = vmul.bf16 1056980736, %v328_v12  ;;  %v309_v32 = vadd.f32 %v1900_v60, %v253_v9  ;;  %v215_v35 = vmul.f32 %v1773_v46, %v1765_v42  ;;  %v1974_v22 = vpop.permute.xlu1 %408 }
  0xad   :  { %439 = vmatpush1.bf16.msra.mxu0 %v377_v23  ;;  %1491 = vtanh.bf16 %v342_v33  ;;  %v134_v58 = vmul.f32 %v1779_v50, %v1835_v19  ;;  %v223_v53 = vmul.f32 %v1773_v46, %v1865_v10  ;;  %v366_v38 = vadd.bf16 1065369472, %v1476_v63  ;;  %v1463_v10 = vld [vmem:[%s2137_s3] sm:$0xff]  }
  0xae   :  { %v1482_v36 = vpop.eup %1481  ;;  %492 = vmatpush1.bf16.msra.mxu1 %v379_v26  ;;  %1493 = vtanh.bf16 %v344_v27  ;;  %v325_v18 = vpack.c.bf16 %v309_v32, %v301_v31  ;;  %v247_v54 = vadd.f32 %v215_v35, %v126_v25  ;;  %v368_v45 = vadd.bf16 1065369472, %v1478_v49 }
  0xaf   :  { %v1484_v59 = vpop.eup %1483  ;;  %v370_v61 = vadd.bf16 1065369472, %v1482_v36  ;;  %v255_v20 = vadd.f32 %v223_v53, %v134_v58  ;;  %v365_v47 = vadd.bf16 1065369472, %v1480_v34  ;;  %v382_v43 = vmul.bf16 1056980736, %v366_v38  ;;  %v1984_v53 = vpop.permute.xlu0 %413 }
  0xb0   :  { %v1486_v28 = vpop.eup %1485  ;;  %v372_v55 = vadd.bf16 1065369472, %v1484_v59  ;;  %v341_v4 = vmul.bf16 1056980736, %v325_v18  ;;  %v303_v37 = vadd.f32 %v1893_v11, %v247_v54  ;;  %v384_v11 = vmul.bf16 1056980736, %v368_v45  ;;  %v1986_v54 = vpop.permute.xlu1 %418 }
  0xb1   :  { %v1488_v56 = vpop.eup %1487  ;;  %v386_v42 = vmul.bf16 1056980736, %v370_v61  ;;  %v369_v29 = vadd.bf16 1065369472, %v1486_v28  ;;  %v311_v46 = vadd.f32 %v1900_v60, %v255_v20  ;;  %v381_v60 = vmul.bf16 1056980736, %v365_v47 }
  0xb2   :  { %v1490_v30 = vpop.eup %1489  ;;  %v388_v41 = vmul.bf16 1056980736, %v372_v55  ;;  %v371_v50 = vadd.bf16 1065369472, %v1488_v56  ;;  %1495 = vtanh.bf16 %v341_v4  ;;  %v2154_v62 = vmov 0  }
  0xb3   :  { %440 = vmatprep.subr.bf16.mxu0 %v386_v42  ;;  %v385_v19 = vmul.bf16 1056980736, %v369_v29  ;;  %v367_v39 = vadd.bf16 1065369472, %v1490_v30  ;;  %v327_v1 = vpack.c.bf16 %v311_v46, %v303_v37 }
  0xb4   :  { %493 = vmatprep.subr.bf16.mxu1 %v388_v41  ;;  %v387_v48 = vmul.bf16 1056980736, %v371_v50 }
  0xb5   :  { %441 = vmatpush1.bf16.msra.mxu0 %v385_v19  ;;  %v343_v51 = vmul.bf16 1056980736, %v327_v1  ;;  %v383_v44 = vmul.bf16 1056980736, %v367_v39 }
  0xb6   :  { %494 = vmatpush1.bf16.msra.mxu1 %v387_v48  ;;  %544 = vmatprep.subr.bf16.mxu0 %v382_v43 }
  0xb7   :  { %597 = vmatprep.subr.bf16.mxu1 %v384_v11  ;;  %1497 = vtanh.bf16 %v343_v51 }
  0xb8   :  { %v1492_v52 = vpop.eup %1491  ;;  %1431 = vmatmul.mubr.msk.bf16.vlgmr.msra.gmra.mrb[0].mxu0 %vm431_vm0, %v1463_v10 }
  0xb9   :  { %v1494_v2 = vpop.eup %1493  ;;  %1433 = vmatmul.mubr.msk.bf16.vlgmr.msra.gmra.mrb[0].mxu1 %vm431_vm0, %v1463_v10  ;;  %545 = vmatpush1.bf16.msra.mxu0 %v381_v60  ;;  %v374_v57 = vadd.bf16 1065369472, %v1492_v52 }
  0xba   :  { %598 = vmatpush1.bf16.msra.mxu1 %v383_v44  ;;  %v376_v3 = vadd.bf16 1065369472, %v1494_v2  ;;  %480 = vmatprep.mubr.bf16.mxu0 %v2154_v62 }
  0xbb   :  { %v390_v40 = vmul.bf16 1056980736, %v374_v57  ;;  %533 = vmatprep.mubr.bf16.mxu1 %v2154_v62 }
  0xbc   :  { %v392_v13 = vmul.bf16 1056980736, %v376_v3 }
  0xbd   :  { %v1496_v6 = vpop.eup %1495  ;;  %546 = vmatprep.subr.bf16.mxu0 %v390_v40 }
  0xbe   :  { %599 = vmatprep.subr.bf16.mxu1 %v392_v13  ;;  %v373_v0 = vadd.bf16 1065369472, %v1496_v6 }
  0xc0   :  { %v389_v14 = vmul.bf16 1056980736, %v373_v0  ;;  %1432 = vmatmul.mubr.msk.bf16.gmra.mrb[4].mxu0 %vm431_vm0, %v1464_v24 }
  0xc1   :  { %1434 = vmatmul.mubr.msk.bf16.gmra.mrb[4].mxu1 %vm431_vm0, %v1464_v24  ;;  %576 = vmatprep.mubr.bf16.mxu0 %v2154_v62 }
  0xc2   :  { %547 = vmatpush1.bf16.msra.mxu0 %v389_v14  ;;  %629 = vmatprep.mubr.bf16.mxu1 %v2154_v62  ;;  %v1498_v15 = vpop.eup %1497 }
  0xc3   :  { %v375_v16 = vadd.bf16 1065369472, %v1498_v15 }
  0xc5   :  { %v391_v17 = vmul.bf16 1056980736, %v375_v16 }
  0xc7   :  { %600 = vmatpush1.bf16.msra.mxu1 %v391_v17 }
  0xc8   :  { %1435 = vmatmul.mubr.msk.bf16.vlgmr.msra.gmra.mrb[8].mxu0 %vm431_vm0, %v1463_v10 }
  0xc9   :  { %586 = vmatprep.mubr.bf16.mxu0 %v2154_v62 }
  0xca   :  { %1437 = vmatmul.mubr.msk.bf16.vlgmr.msra.gmra.mrb[8].mxu1 %vm431_vm0, %v1463_v10 }
  0xcb   :  { %639 = vmatprep.mubr.bf16.mxu1 %v2154_v62 }
  0xd0   :  { %1436 = vmatmul.mubr.msk.bf16.gmra.mrb[12].mxu0 %vm431_vm0, %v1464_v24 }
  0xd1   :  { %806 = vmatprep.mubr.bf16.mxu0 %v2154_v62 }
  0xd2   :  { %1438 = vmatmul.mubr.msk.bf16.gmra.mrb[12].mxu1 %vm431_vm0, %v1464_v24 }
  0xd3   :  { %859 = vmatprep.mubr.bf16.mxu1 %v2154_v62 }
 0x18b   :  { %v472_v7 = vpop.f32.mrb[0].mxu0 }
 0x18c   :  { %v525_v63 = vpop.f32.mrb[0].mxu1  ;;  %v474_v8 = vpop.f32.mrb[1].mxu0  ;;  %v473_v9 = vadd.f32 %v472_v7, %v1972_v21 }
 0x18d   :  { %v527_v5 = vpop.f32.mrb[1].mxu1  ;;  %v476_v12 = vpop.f32.mrb[2].mxu0  ;;  %v526_v25 = vadd.f32 %v525_v63, %v1972_v21  ;;  %v475_v34 = vadd.f32 %v474_v8, %v1972_v21 }
 0x18e   :  { %v477_v49 = vadd.f32 %v476_v12, %v1974_v22  ;;  %v529_v23 = vpop.f32.mrb[2].mxu1  ;;  %v478_v33 = vpop.f32.mrb[3].mxu0  ;;  %v528_v32 = vadd.f32 %v527_v5, %v1972_v21 }
 0x18f   :  { %v530_v26 = vadd.f32 %v529_v23, %v1974_v22  ;;  %v479_v27 = vadd.f32 %v478_v33, %v1974_v22  ;;  %v531_v31 = vpop.f32.mrb[3].mxu1 }
 0x190   :  { %v650_v35 = vpack.c.bf16 %v477_v49, %v473_v9  ;;  %v532_v36 = vadd.f32 %v531_v31, %v1974_v22 }
 0x191   :  { %v652_v18 = vpack.c.bf16 %v530_v26, %v526_v25  ;;  %v651_v58 = vpack.c.bf16 %v479_v27, %v475_v34 }
 0x192   :  { %v666_v59 = vmul.bf16 1056980736, %v650_v35  ;;  %v653_v61 = vpack.c.bf16 %v532_v36, %v528_v32 }
 0x193   :  { %v668_v28 = vmul.bf16 1056980736, %v652_v18  ;;  %v667_v55 = vmul.bf16 1056980736, %v651_v58  ;;  %v482_v38 = vpop.f32.mrb[4].mxu0 }
 0x194   :  { %1499 = vtanh.bf16 %v666_v59  ;;  %v669_v4 = vmul.bf16 1056980736, %v653_v61  ;;  %v535_v20 = vpop.f32.mrb[4].mxu1  ;;  %v484_v56 = vpop.f32.mrb[5].mxu0  ;;  %v483_v45 = vadd.f32 %v482_v38, %v1984_v53 }
 0x195   :  { %1501 = vtanh.bf16 %v668_v28  ;;  %v537_v42 = vpop.f32.mrb[5].mxu1  ;;  %v486_v29 = vpop.f32.mrb[6].mxu0  ;;  %v536_v37 = vadd.f32 %v535_v20, %v1984_v53  ;;  %v485_v46 = vadd.f32 %v484_v56, %v1984_v53 }
 0x196   :  { %1503 = vtanh.bf16 %v667_v55  ;;  %v487_v30 = vadd.f32 %v486_v29, %v1986_v54  ;;  %v539_v41 = vpop.f32.mrb[6].mxu1  ;;  %v488_v50 = vpop.f32.mrb[7].mxu0  ;;  %v538_v48 = vadd.f32 %v537_v42, %v1984_v53 }
 0x197   :  { %1505 = vtanh.bf16 %v669_v4  ;;  %v540_v19 = vadd.f32 %v539_v41, %v1986_v54  ;;  %v489_v10 = vadd.f32 %v488_v50, %v1986_v54  ;;  %v541_v47 = vpop.f32.mrb[7].mxu1 }
 0x198   :  { %v658_v43 = vpack.c.bf16 %v487_v30, %v483_v45  ;;  %v542_v39 = vadd.f32 %v541_v47, %v1986_v54 }
 0x199   :  { %v660_v1 = vpack.c.bf16 %v540_v19, %v536_v37  ;;  %v659_v11 = vpack.c.bf16 %v489_v10, %v485_v46 }
 0x19a   :  { %v674_v51 = vmul.bf16 1056980736, %v658_v43  ;;  %v661_v60 = vpack.c.bf16 %v542_v39, %v538_v48 }
 0x19b   :  { %v676_v52 = vmul.bf16 1056980736, %v660_v1  ;;  %v675_v44 = vmul.bf16 1056980736, %v659_v11  ;;  %v578_v2 = vpop.f32.mrb[8].mxu0 }
 0x19c   :  { %1507 = vtanh.bf16 %v674_v51  ;;  %v677_v57 = vmul.bf16 1056980736, %v661_v60  ;;  %v580_v3 = vpop.f32.mrb[9].mxu0  ;;  %v579_v13 = vadd.f32 %v578_v2, %v1972_v21 }
 0x19d   :  { %1509 = vtanh.bf16 %v676_v52  ;;  %v582_v40 = vpop.f32.mrb[10].mxu0  ;;  %v631_v24 = vpop.f32.mrb[8].mxu1  ;;  %v581_v15 = vadd.f32 %v580_v3, %v1972_v21 }
 0x19e   :  { %1511 = vtanh.bf16 %v675_v44  ;;  %v583_v6 = vadd.f32 %v582_v40, %v1974_v22  ;;  %v584_v0 = vpop.f32.mrb[11].mxu0  ;;  %v633_v16 = vpop.f32.mrb[9].mxu1  ;;  %v632_v9 = vadd.f32 %v631_v24, %v1972_v21 }
 0x19f   :  { %v1500_v14 = vpop.eup %1499  ;;  %1513 = vtanh.bf16 %v677_v57  ;;  %v585_v17 = vadd.f32 %v584_v0, %v1974_v22  ;;  %v635_v5 = vpop.f32.mrb[10].mxu1  ;;  %v634_v34 = vadd.f32 %v633_v16, %v1972_v21 }
 0x1a0   :  { %v1502_v7 = vpop.eup %1501  ;;  %v698_v63 = vadd.bf16 1065369472, %v1500_v14  ;;  %v654_v8 = vpack.c.bf16 %v583_v6, %v579_v13  ;;  %v636_v49 = vadd.f32 %v635_v5, %v1974_v22  ;;  %v637_v33 = vpop.f32.mrb[11].mxu1 }
 0x1a1   :  { %v1504_v12 = vpop.eup %1503  ;;  %v655_v23 = vpack.c.bf16 %v585_v17, %v581_v15  ;;  %v638_v27 = vadd.f32 %v637_v33, %v1974_v22  ;;  %v700_v32 = vadd.bf16 1065369472, %v1502_v7  ;;  %v1465_v17 = vld [vmem:[%s2139_s5] sm:$0xff]  }
 0x1a2   :  { %v1506_v25 = vpop.eup %1505  ;;  %v670_v26 = vmul.bf16 1056980736, %v654_v8  ;;  %v699_v31 = vadd.bf16 1065369472, %v1504_v12  ;;  %v656_v35 = vpack.c.bf16 %v636_v49, %v632_v9  ;;  %v714_v58 = vmul.bf16 1056980736, %v698_v63 }
 0x1a3   :  { %v671_v36 = vmul.bf16 1056980736, %v655_v23  ;;  %v588_v18 = vpop.f32.mrb[12].mxu0  ;;  %v657_v59 = vpack.c.bf16 %v638_v27, %v634_v34  ;;  %v701_v4 = vadd.bf16 1065369472, %v1506_v25  ;;  %v1466_v34 = vld [vmem:[%s2139_s5 + $0x8] sm:$0xff]  }
 0x1a4   :  { %1515 = vtanh.bf16 %v670_v26  ;;  %v590_v61 = vpop.f32.mrb[13].mxu0  ;;  %v715_v28 = vmul.bf16 1056980736, %v699_v31  ;;  %v672_v55 = vmul.bf16 1056980736, %v656_v35  ;;  %v589_v21 = vadd.f32 %v588_v18, %v1984_v53 }
 0x1a5   :  { %1517 = vtanh.bf16 %v671_v36  ;;  %v592_v38 = vpop.f32.mrb[14].mxu0  ;;  %v673_v20 = vmul.bf16 1056980736, %v657_v59  ;;  %v641_v56 = vpop.f32.mrb[12].mxu1  ;;  %v591_v45 = vadd.f32 %v590_v61, %v1984_v53  ;;  %v717_v30 = vmul.bf16 1056980736, %v701_v4 }
 0x1a6   :  { %v593_v22 = vadd.f32 %v592_v38, %v1986_v54  ;;  %774 = vmatprep.subr.bf16.mxu0 %v715_v28  ;;  %v594_v42 = vpop.f32.mrb[15].mxu0  ;;  %1519 = vtanh.bf16 %v672_v55  ;;  %v643_v37 = vpop.f32.mrb[13].mxu1  ;;  %v716_v46 = vmul.bf16 1056980736, %v700_v32  ;;  %v642_v19 = vadd.f32 %v641_v56, %v1984_v53 }
 0x1a7   :  { %v1508_v29 = vpop.eup %1507  ;;  %v595_v41 = vadd.f32 %v594_v42, %v1986_v54  ;;  %775 = vmatpush1.bf16.msra.mxu0 %v714_v58  ;;  %1521 = vtanh.bf16 %v673_v20  ;;  %v645_v47 = vpop.f32.mrb[14].mxu1  ;;  %v644_v39 = vadd.f32 %v643_v37, %v1984_v53  ;;  %827 = vmatprep.subr.bf16.mxu1 %v717_v30 }
 0x1a8   :  { %v1510_v50 = vpop.eup %1509  ;;  %v662_v10 = vpack.c.bf16 %v593_v22, %v589_v21  ;;  %v706_v43 = vadd.bf16 1065369472, %v1508_v29  ;;  %v646_v1 = vadd.f32 %v645_v47, %v1986_v54  ;;  %v647_v51 = vpop.f32.mrb[15].mxu1  ;;  %828 = vmatpush1.bf16.msra.mxu1 %v716_v46 }
 0x1a9   :  { %v1512_v48 = vpop.eup %1511  ;;  %v663_v11 = vpack.c.bf16 %v595_v41, %v591_v45  ;;  %v708_v52 = vadd.bf16 1065369472, %v1510_v50  ;;  %v648_v2 = vadd.f32 %v647_v51, %v1986_v54  ;;  %v2034_v4 = vpop.permute.xlu0 %740 }
 0x1aa   :  { %v1514_v60 = vpop.eup %1513  ;;  %v678_v44 = vmul.bf16 1056980736, %v662_v10  ;;  %v707_v57 = vadd.bf16 1065369472, %v1512_v48  ;;  %v664_v3 = vpack.c.bf16 %v646_v1, %v642_v19  ;;  %v722_v0 = vmul.bf16 1056980736, %v706_v43  ;;  %v2036_v20 = vpop.permute.xlu1 %745 }
 0x1ab   :  { %v679_v40 = vmul.bf16 1056980736, %v663_v11  ;;  %v709_v13 = vadd.bf16 1065369472, %v1514_v60  ;;  %v665_v24 = vpack.c.bf16 %v648_v2, %v644_v39  ;;  %v724_v15 = vmul.bf16 1056980736, %v708_v52 }
 0x1ac   :  { %1523 = vtanh.bf16 %v678_v44  ;;  %v723_v6 = vmul.bf16 1056980736, %v707_v57  ;;  %v680_v53 = vmul.bf16 1056980736, %v664_v3 }
 0x1ad   :  { %1525 = vtanh.bf16 %v679_v40  ;;  %v725_v14 = vmul.bf16 1056980736, %v709_v13  ;;  %v681_v16 = vmul.bf16 1056980736, %v665_v24  ;;  %v2046_v51 = vpop.permute.xlu0 %750 }
 0x1ae   :  { %776 = vmatprep.subr.bf16.mxu0 %v723_v6  ;;  %1527 = vtanh.bf16 %v680_v53  ;;  %v2048_v44 = vpop.permute.xlu1 %755 }
 0x1af   :  { %v1516_v54 = vpop.eup %1515  ;;  %829 = vmatprep.subr.bf16.mxu1 %v725_v14  ;;  %777 = vmatpush1.bf16.msra.mxu0 %v722_v0  ;;  %1529 = vtanh.bf16 %v681_v16 }
 0x1b0   :  { %v1518_v7 = vpop.eup %1517  ;;  %v702_v63 = vadd.bf16 1065369472, %v1516_v54  ;;  %830 = vmatpush1.bf16.msra.mxu1 %v724_v15 }
 0x1b1   :  { %v703_v8 = vadd.bf16 1065369472, %v1518_v7  ;;  %v1520_v5 = vpop.eup %1519 }
 0x1b2   :  { %1441 = vmatmul.mubr.msk.bf16.vlgmr.msra.gmra.mrb[16].mxu0 %vm431_vm0, %v1465_v17  ;;  %v1522_v12 = vpop.eup %1521  ;;  %v704_v9 = vadd.bf16 1065369472, %v1520_v5  ;;  %v718_v23 = vmul.bf16 1056980736, %v702_v63 }
 0x1b3   :  { %1443 = vmatmul.mubr.msk.bf16.vlgmr.msra.gmra.mrb[16].mxu1 %vm431_vm0, %v1465_v17  ;;  %v719_v49 = vmul.bf16 1056980736, %v703_v8  ;;  %816 = vmatprep.mubr.bf16.mxu0 %v2154_v62  ;;  %v705_v33 = vadd.bf16 1065369472, %v1522_v12 }
 0x1b4   :  { %869 = vmatprep.mubr.bf16.mxu1 %v2154_v62  ;;  %v720_v27 = vmul.bf16 1056980736, %v704_v9 }
 0x1b5   :  { %880 = vmatprep.subr.bf16.mxu0 %v719_v49  ;;  %v721_v25 = vmul.bf16 1056980736, %v705_v33 }
 0x1b6   :  { %881 = vmatpush1.bf16.msra.mxu0 %v718_v23 }
 0x1b7   :  { %v1524_v26 = vpop.eup %1523  ;;  %933 = vmatprep.subr.bf16.mxu1 %v721_v25 }
 0x1b8   :  { %v1526_v31 = vpop.eup %1525  ;;  %v710_v32 = vadd.bf16 1065369472, %v1524_v26  ;;  %934 = vmatpush1.bf16.msra.mxu1 %v720_v27 }
 0x1b9   :  { %v711_v35 = vadd.bf16 1065369472, %v1526_v31  ;;  %v1528_v36 = vpop.eup %1527 }
 0x1ba   :  { %1442 = vmatmul.mubr.msk.bf16.gmra.mrb[20].mxu0 %vm431_vm0, %v1466_v34  ;;  %v1530_v18 = vpop.eup %1529  ;;  %v712_v58 = vadd.bf16 1065369472, %v1528_v36  ;;  %v726_v61 = vmul.bf16 1056980736, %v710_v32 }
 0x1bb   :  { %1444 = vmatmul.mubr.msk.bf16.gmra.mrb[20].mxu1 %vm431_vm0, %v1466_v34  ;;  %v727_v59 = vmul.bf16 1056980736, %v711_v35  ;;  %912 = vmatprep.mubr.bf16.mxu0 %v2154_v62  ;;  %v713_v28 = vadd.bf16 1065369472, %v1530_v18 }
 0x1bc   :  { %965 = vmatprep.mubr.bf16.mxu1 %v2154_v62  ;;  %v728_v38 = vmul.bf16 1056980736, %v712_v58 }
 0x1bd   :  { %882 = vmatprep.subr.bf16.mxu0 %v727_v59  ;;  %v729_v55 = vmul.bf16 1056980736, %v713_v28 }
 0x1be   :  { %883 = vmatpush1.bf16.msra.mxu0 %v726_v61 }
 0x1bf   :  { %935 = vmatprep.subr.bf16.mxu1 %v729_v55 }
 0x1c0   :  { %936 = vmatpush1.bf16.msra.mxu1 %v728_v38 }
 0x1c2   :  { %1445 = vmatmul.mubr.msk.bf16.vlgmr.msra.gmra.mrb[24].mxu0 %vm431_vm0, %v1465_v17 }
 0x1c3   :  { %922 = vmatprep.mubr.bf16.mxu0 %v2154_v62  ;;  %1447 = vmatmul.mubr.msk.bf16.vlgmr.msra.gmra.mrb[24].mxu1 %vm431_vm0, %v1465_v17 }
 0x1c4   :  { %975 = vmatprep.mubr.bf16.mxu1 %v2154_v62 }
 0x1ca   :  { %1446 = vmatmul.mubr.msk.bf16.gmra.mrb[28].mxu0 %vm431_vm0, %v1466_v34 }
 0x1cb   :  { %1108 = vmatprep.mubr.bf16.mxu0 %v2154_v62  ;;  %1448 = vmatmul.mubr.msk.bf16.gmra.mrb[28].mxu1 %vm431_vm0, %v1466_v34 }
 0x1cc   :  { %1149 = vmatprep.mubr.bf16.mxu1 %v2154_v62 }
 0x285   :  { %v808_v21 = vpop.f32.mrb[16].mxu0 }
 0x286   :  { %v861_v56 = vpop.f32.mrb[16].mxu1  ;;  %v810_v22 = vpop.f32.mrb[17].mxu0  ;;  %v809_v45 = vadd.f32 %v808_v21, %v2034_v4 }
 0x287   :  { %v863_v42 = vpop.f32.mrb[17].mxu1  ;;  %v812_v29 = vpop.f32.mrb[18].mxu0  ;;  %v862_v50 = vadd.f32 %v861_v56, %v2034_v4  ;;  %v811_v46 = vadd.f32 %v810_v22, %v2034_v4 }
 0x288   :  { %v813_v37 = vadd.f32 %v812_v29, %v2036_v20  ;;  %v865_v30 = vpop.f32.mrb[18].mxu1  ;;  %v814_v41 = vpop.f32.mrb[19].mxu0  ;;  %v864_v48 = vadd.f32 %v863_v42, %v2034_v4 }
 0x289   :  { %v866_v19 = vadd.f32 %v865_v30, %v2036_v20  ;;  %v815_v10 = vadd.f32 %v814_v41, %v2036_v20  ;;  %v867_v47 = vpop.f32.mrb[19].mxu1 }
 0x28a   :  { %v986_v43 = vpack.c.bf16 %v813_v37, %v809_v45  ;;  %v868_v39 = vadd.f32 %v867_v47, %v2036_v20 }
 0x28b   :  { %v988_v1 = vpack.c.bf16 %v866_v19, %v862_v50  ;;  %v987_v11 = vpack.c.bf16 %v815_v10, %v811_v46 }
 0x28c   :  { %v1002_v60 = vmul.bf16 1056980736, %v986_v43  ;;  %v989_v52 = vpack.c.bf16 %v868_v39, %v864_v48 }
 0x28d   :  { %v1004_v2 = vmul.bf16 1056980736, %v988_v1  ;;  %v1003_v57 = vmul.bf16 1056980736, %v987_v11  ;;  %v818_v3 = vpop.f32.mrb[20].mxu0 }
 0x28e   :  { %1531 = vtanh.bf16 %v1002_v60  ;;  %v1005_v40 = vmul.bf16 1056980736, %v989_v52  ;;  %v871_v13 = vpop.f32.mrb[20].mxu1  ;;  %v820_v24 = vpop.f32.mrb[21].mxu0  ;;  %v819_v53 = vadd.f32 %v818_v3, %v2046_v51 }
 0x28f   :  { %1533 = vtanh.bf16 %v1004_v2  ;;  %v873_v6 = vpop.f32.mrb[21].mxu1  ;;  %v822_v0 = vpop.f32.mrb[22].mxu0  ;;  %v872_v14 = vadd.f32 %v871_v13, %v2046_v51  ;;  %v821_v54 = vadd.f32 %v820_v24, %v2046_v51 }
 0x290   :  { %1535 = vtanh.bf16 %v1003_v57  ;;  %v823_v15 = vadd.f32 %v822_v0, %v2048_v44  ;;  %v875_v16 = vpop.f32.mrb[22].mxu1  ;;  %v824_v17 = vpop.f32.mrb[23].mxu0  ;;  %v874_v5 = vadd.f32 %v873_v6, %v2046_v51 }
 0x291   :  { %1537 = vtanh.bf16 %v1005_v40  ;;  %v876_v7 = vadd.f32 %v875_v16, %v2048_v44  ;;  %v825_v63 = vadd.f32 %v824_v17, %v2048_v44  ;;  %v877_v8 = vpop.f32.mrb[23].mxu1 }
 0x292   :  { %v994_v12 = vpack.c.bf16 %v823_v15, %v819_v53  ;;  %v878_v9 = vadd.f32 %v877_v8, %v2048_v44 }
 0x293   :  { %v996_v49 = vpack.c.bf16 %v876_v7, %v872_v14  ;;  %v995_v23 = vpack.c.bf16 %v825_v63, %v821_v54 }
 0x294   :  { %v1010_v33 = vmul.bf16 1056980736, %v994_v12  ;;  %v997_v25 = vpack.c.bf16 %v878_v9, %v874_v5 }
 0x295   :  { %v1012_v34 = vmul.bf16 1056980736, %v996_v49  ;;  %v1011_v26 = vmul.bf16 1056980736, %v995_v23  ;;  %v914_v27 = vpop.f32.mrb[24].mxu0 }
 0x296   :  { %1539 = vtanh.bf16 %v1010_v33  ;;  %v1013_v31 = vmul.bf16 1056980736, %v997_v25  ;;  %v916_v32 = vpop.f32.mrb[25].mxu0  ;;  %v967_v35 = vpop.f32.mrb[24].mxu1  ;;  %v915_v18 = vadd.f32 %v914_v27, %v2034_v4 }
 0x297   :  { %1541 = vtanh.bf16 %v1012_v34  ;;  %v918_v36 = vpop.f32.mrb[26].mxu0  ;;  %v969_v58 = vpop.f32.mrb[25].mxu1  ;;  %v917_v55 = vadd.f32 %v916_v32, %v2034_v4  ;;  %v968_v42 = vadd.f32 %v967_v35, %v2034_v4 }
 0x298   :  { %1543 = vtanh.bf16 %v1011_v26  ;;  %v919_v59 = vadd.f32 %v918_v36, %v2036_v20  ;;  %v920_v61 = vpop.f32.mrb[27].mxu0  ;;  %v971_v38 = vpop.f32.mrb[26].mxu1  ;;  %v970_v41 = vadd.f32 %v969_v58, %v2034_v4 }
 0x299   :  { %v1532_v28 = vpop.eup %1531  ;;  %1545 = vtanh.bf16 %v1013_v31  ;;  %v921_v21 = vadd.f32 %v920_v61, %v2036_v20  ;;  %v972_v45 = vadd.f32 %v971_v38, %v2036_v20  ;;  %v973_v37 = vpop.f32.mrb[27].mxu1  ;;  %v1066_v38 = vld [vmem:[%s2141_s7] sm:$0x1]  ;;  %s1622_s7 = smov [#allocation2]  }
 0x29a   :  { %v1534_v56 = vpop.eup %1533  ;;  %v1034_v22 = vadd.bf16 1065369472, %v1532_v28  ;;  %v990_v29 = vpack.c.bf16 %v919_v59, %v915_v18  ;;  %v974_v46 = vadd.f32 %v973_v37, %v2036_v20  ;;  %s1420_s27 = sshll.u32 %s1622_s7, 4  ;;  %s1421_s27 = int_to_ptr.vmem [resolvable:$true] %s1420_s27 }
 0x29b   :  { %v1536_v30 = vpop.eup %1535  ;;  %v991_v50 = vpack.c.bf16 %v921_v21, %v917_v55  ;;  %v1036_v10 = vadd.bf16 1065369472, %v1534_v56  ;;  %v992_v48 = vpack.c.bf16 %v972_v45, %v968_v42  ;;  %s1595_s28 = scalar_lea.vmem %s1421_s27, 256  ;;  %p1600_p1 = scmp.lt.s32.totalorder %s1421_s27, %s1421_s27 }
 0x29c   :  { %v1538_v19 = vpop.eup %1537  ;;  %v1006_v47 = vmul.bf16 1056980736, %v990_v29  ;;  %v1035_v43 = vadd.bf16 1065369472, %v1536_v30  ;;  %v1050_v39 = vmul.bf16 1056980736, %v1034_v22  ;;  %v993_v11 = vpack.c.bf16 %v974_v46, %v970_v41  ;;  %p1596_p0 = scmp.ne.s32.totalorder %s1421_s27, %s1595_s28  ;;  %p1601_p2 = scmp.lt.s32.totalorder %s1595_s28, %s1595_s28 }
 0x29d   :  { %v1007_v1 = vmul.bf16 1056980736, %v991_v50  ;;  %v924_v60 = vpop.f32.mrb[28].mxu0  ;;  %v1008_v52 = vmul.bf16 1056980736, %v992_v48 }
 0x29e   :  { %1547 = vtanh.bf16 %v1006_v47  ;;  %v926_v2 = vpop.f32.mrb[29].mxu0  ;;  %v1051_v57 = vmul.bf16 1056980736, %v1035_v43  ;;  %v1009_v3 = vmul.bf16 1056980736, %v993_v11  ;;  %v977_v40 = vpop.f32.mrb[28].mxu1  ;;  %v925_v20 = vadd.f32 %v924_v60, %v2046_v51  ;;  %p1602_p3 = por %p1601_p2, %p1600_p1 }
 0x29f   :  { %1549 = vtanh.bf16 %v1007_v1  ;;  %v928_v4 = vpop.f32.mrb[30].mxu0  ;;  %v1037_v13 = vadd.bf16 1065369472, %v1538_v19  ;;  %v979_v24 = vpop.f32.mrb[29].mxu1  ;;  %v927_v14 = vadd.f32 %v926_v2, %v2046_v51  ;;  %v1052_v7 = vmul.bf16 1056980736, %v1036_v10 }
 0x2a0   :  { %1551 = vtanh.bf16 %v1008_v52  ;;  %v929_v6 = vadd.f32 %v928_v4, %v2048_v44  ;;  %1076 = vmatprep.subr.bf16.mxu0 %v1051_v57  ;;  %v930_v0 = vpop.f32.mrb[31].mxu0  ;;  %v981_v15 = vpop.f32.mrb[30].mxu1  ;;  %v978_v63 = vadd.f32 %v977_v40, %v2046_v51  ;;  %v980_v23 = vadd.f32 %v979_v24, %v2046_v51  ;;  %p1603_p4 = pnand %p1602_p3, %p1596_p0 }
 0x2a1   :  { %v1540_v53 = vpop.eup %1539  ;;  %1553 = vtanh.bf16 %v1009_v3  ;;  %v1053_v16 = vmul.bf16 1056980736, %v1037_v13  ;;  %v931_v17 = vadd.f32 %v930_v0, %v2048_v44  ;;  %1077 = vmatpush1.bf16.msra.mxu0 %v1050_v39  ;;  %v982_v5 = vadd.f32 %v981_v15, %v2048_v44  ;;  %v983_v12 = vpop.f32.mrb[31].mxu1 }
 0x2a2   :  { %v1542_v54 = vpop.eup %1541  ;;  %v998_v8 = vpack.c.bf16 %v929_v6, %v925_v20  ;;  %v1042_v49 = vadd.bf16 1065369472, %v1540_v53  ;;  %v984_v25 = vadd.f32 %v983_v12, %v2048_v44 }
 0x2a3   :  { %v1544_v9 = vpop.eup %1543  ;;  %1117 = vmatprep.subr.bf16.mxu1 %v1053_v16  ;;  %v999_v33 = vpack.c.bf16 %v931_v17, %v927_v14  ;;  %v1044_v26 = vadd.bf16 1065369472, %v1542_v54  ;;  %v1000_v31 = vpack.c.bf16 %v982_v5, %v978_v63 }
 0x2a4   :  { %v1546_v34 = vpop.eup %1545  ;;  %v1014_v27 = vmul.bf16 1056980736, %v998_v8  ;;  %1118 = vmatpush1.bf16.msra.mxu1 %v1052_v7  ;;  %v1043_v32 = vadd.bf16 1065369472, %v1544_v9  ;;  %v1001_v36 = vpack.c.bf16 %v984_v25, %v980_v23  ;;  %v1058_v61 = vmul.bf16 1056980736, %v1042_v49 }
 0x2a5   :  { %v1015_v35 = vmul.bf16 1056980736, %v999_v33  ;;  %v1045_v18 = vadd.bf16 1065369472, %v1546_v34  ;;  %v1016_v58 = vmul.bf16 1056980736, %v1000_v31 }
 0x2a6   :  { %1555 = vtanh.bf16 %v1014_v27  ;;  %v1059_v59 = vmul.bf16 1056980736, %v1043_v32  ;;  %v1017_v28 = vmul.bf16 1056980736, %v1001_v36  ;;  %v1060_v55 = vmul.bf16 1056980736, %v1044_v26 }
 0x2a7   :  { %1557 = vtanh.bf16 %v1015_v35  ;;  %v1061_v51 = vmul.bf16 1056980736, %v1045_v18 }
 0x2a8   :  { %1559 = vtanh.bf16 %v1016_v58  ;;  %1078 = vmatprep.subr.bf16.mxu0 %v1059_v59 }
 0x2a9   :  { %v1548_v44 = vpop.eup %1547  ;;  %1561 = vtanh.bf16 %v1017_v28  ;;  %1119 = vmatprep.subr.bf16.mxu1 %v1061_v51  ;;  %1079 = vmatpush1.bf16.msra.mxu0 %v1058_v61 }
 0x2aa   :  { %v1550_v21 = vpop.eup %1549  ;;  %v1038_v56 = vadd.bf16 1065369472, %v1548_v44  ;;  %1120 = vmatpush1.bf16.msra.mxu1 %v1060_v55 }
 0x2ab   :  { %v1552_v22 = vpop.eup %1551  ;;  %v1039_v42 = vadd.bf16 1065369472, %v1550_v21 }
 0x2ac   :  { %v1554_v29 = vpop.eup %1553  ;;  %v1040_v45 = vadd.bf16 1065369472, %v1552_v22  ;;  %1449 = vmatmul.mubr.msk.bf16.vlgmr.msra.gmra.mrb[32].mxu0 %vm431_vm0, %v1066_v38  ;;  %v1054_v41 = vmul.bf16 1056980736, %v1038_v56 }
 0x2ad   :  { %1450 = vmatmul.mubr.msk.bf16.vlgmr.msra.gmra.mrb[32].mxu1 %vm431_vm0, %v1066_v38  ;;  %v1055_v37 = vmul.bf16 1056980736, %v1039_v42  ;;  %v1041_v30 = vadd.bf16 1065369472, %v1554_v29  ;;  %1190 = vmatprep.mubr.bf16.mxu0 %v2154_v62 }
 0x2ae   :  { %1231 = vmatprep.mubr.bf16.mxu1 %v2154_v62  ;;  %v1056_v46 = vmul.bf16 1056980736, %v1040_v45  ;;  %v1071_v62 = vpop.permute.xlu0 %1070 }
 0x2af   :  { %1158 = vmatprep.subr.bf16.mxu0 %v1055_v37  ;;  %v1057_v50 = vmul.bf16 1056980736, %v1041_v30 }
 0x2b0   :  { %1159 = vmatpush1.bf16.msra.mxu0 %v1054_v41 }
 0x2b1   :  { %v1556_v19 = vpop.eup %1555  ;;  %1199 = vmatprep.subr.bf16.mxu1 %v1057_v50 }
 0x2b2   :  { %v1558_v10 = vpop.eup %1557  ;;  %v1046_v47 = vadd.bf16 1065369472, %v1556_v19  ;;  %1200 = vmatpush1.bf16.msra.mxu1 %v1056_v46 }
 0x2b3   :  { %v1560_v48 = vpop.eup %1559  ;;  %v1047_v43 = vadd.bf16 1065369472, %v1558_v10 }
 0x2b4   :  { %v1562_v39 = vpop.eup %1561  ;;  %v1048_v1 = vadd.bf16 1065369472, %v1560_v48  ;;  %v1062_v52 = vmul.bf16 1056980736, %v1046_v47 }
 0x2b5   :  { %v1063_v11 = vmul.bf16 1056980736, %v1047_v43  ;;  %v1049_v60 = vadd.bf16 1065369472, %v1562_v39 }
 0x2b6   :  { %v1064_v57 = vmul.bf16 1056980736, %v1048_v1 }
 0x2b7   :  { %1160 = vmatprep.subr.bf16.mxu0 %v1063_v11  ;;  %v1065_v2 = vmul.bf16 1056980736, %v1049_v60 }
 0x2b8   :  { %1161 = vmatpush1.bf16.msra.mxu0 %v1062_v52 }
 0x2b9   :  { %1201 = vmatprep.subr.bf16.mxu1 %v1065_v2 }
 0x2ba   :  { %1202 = vmatpush1.bf16.msra.mxu1 %v1064_v57  ;;  %v1621_v57 = vmov 1983009808  }
 0x2bb   :  { %1451 = vmatmul.mubr.msk.bf16.vlgmr.msra.gmra.mrb[36].mxu0 %vm431_vm0, %v1066_v38 }
 0x2bd   :  { %1452 = vmatmul.mubr.msk.bf16.vlgmr.msra.gmra.mrb[36].mxu1 %vm431_vm0, %v1066_v38 }
 0x37f   :  { %v1110_v3 = vpop.f32.mrb[32].mxu0 }
 0x380   :  { %v2083_v40 = vadd.f32 %v1110_v3, %v1071_v62  ;;  %v1151_v4 = vpop.f32.mrb[32].mxu1  ;;  %v1112_v13 = vpop.f32.mrb[33].mxu0 }
 0x381   :  { %v2085_v20 = vadd.f32 %v1151_v4, %v1071_v62  ;;  %v2087_v24 = vadd.f32 %v1112_v13, %v1071_v62  ;;  %v1153_v6 = vpop.f32.mrb[33].mxu1  ;;  %v1114_v0 = vpop.f32.mrb[34].mxu0 }
 0x382   :  { %v1248_v53 = vand.u32 2147483647, %v2083_v40  ;;  %v2090_v14 = vadd.f32 %v1153_v6, %v1071_v62  ;;  %v1155_v15 = vpop.f32.mrb[34].mxu1  ;;  %v1115_v16 = vpop.f32.mrb[35].mxu0  ;;  %v1240_v3 = vmax.f32 %v2083_v40, 0.0 }
 0x383   :  { %v1250_v17 = vand.u32 2147483647, %v2085_v20  ;;  %v1249_v54 = vand.u32 2147483647, %v2087_v24  ;;  %v1156_v8 = vpop.f32.mrb[35].mxu1  ;;  %v1242_v0 = vmax.f32 %v2085_v20, 0.0 }
 0x384   :  { %v1256_v7 = vsub.f32 0.0, %v1248_v53  ;;  %v1251_v63 = vand.u32 2147483647, %v2090_v14 }
 0x385   :  { %v1258_v5 = vsub.f32 0.0, %v1250_v17  ;;  %v1257_v12 = vsub.f32 0.0, %v1249_v54 }
 0x386   :  { %v1264_v9 = vmul.f32 1.442695, %v1256_v7  ;;  %v1259_v49 = vsub.f32 0.0, %v1251_v63 }
 0x387   :  { %v1268_v23 = vmul.f32 1.442695, %v1258_v5  ;;  %v1266_v33 = vmul.f32 1.442695, %v1257_v12 }
 0x388   :  { %1563 = vpow2.f32 %v1264_v9  ;;  %v1270_v25 = vmul.f32 1.442695, %v1259_v49 }
 0x389   :  { %1565 = vpow2.f32 %v1268_v23 }
 0x38a   :  { %1567 = vpow2.f32 %v1266_v33 }
 0x38b   :  { %1569 = vpow2.f32 %v1270_v25  ;;  %v1241_v25 = vmax.f32 %v2087_v24, 0.0 }
 0x38e   :  { %v1192_v34 = vpop.f32.mrb[36].mxu0 }
 0x38f   :  { %v2095_v26 = vadd.f32 %v1192_v34, %v1071_v62  ;;  %v1194_v27 = vpop.f32.mrb[37].mxu0 }
 0x390   :  { %v1233_v31 = vpop.f32.mrb[36].mxu1  ;;  %v1196_v32 = vpop.f32.mrb[38].mxu0  ;;  %v2098_v59 = vadd.f32 %v1194_v27, %v1071_v62 }
 0x391   :  { %v1252_v35 = vand.u32 2147483647, %v2095_v26  ;;  %v1235_v36 = vpop.f32.mrb[37].mxu1  ;;  %v1197_v18 = vpop.f32.mrb[39].mxu0  ;;  %v2102_v42 = vadd.f32 %v1233_v31, %v1071_v62 }
 0x392   :  { %v1564_v58 = vpop.eup %1563  ;;  %v1237_v61 = vpop.f32.mrb[38].mxu1  ;;  %v1253_v29 = vand.u32 2147483647, %v2098_v59  ;;  %v2106_v37 = vadd.f32 %v1235_v36, %v1071_v62  ;;  %v1379_v62 = vunpack.c.l.s4 %v1621_v57 }
 0x393   :  { %v1566_v28 = vpop.eup %1565  ;;  %v1280_v51 = vadd.f32 1.0, %v1564_v58  ;;  %v1238_v55 = vpop.f32.mrb[39].mxu1  ;;  %v1260_v22 = vsub.f32 0.0, %v1252_v35  ;;  %v1283_v30 = vmul.f32 -0.5, %v1564_v58  ;;  %v1254_v46 = vand.u32 2147483647, %v2102_v42 }
 0x394   :  { %v1568_v44 = vpop.eup %1567  ;;  %v1298_v38 = vadd.f32 1.0, %v1566_v28  ;;  %v1301_v41 = vmul.f32 -0.5, %v1566_v28  ;;  %v1261_v10 = vsub.f32 0.0, %v1253_v29  ;;  %v1255_v48 = vand.u32 2147483647, %v2106_v37 }
 0x395   :  { %v2100_v21 = vpop.eup %1569  ;;  %1571 = vlog2.f32 %v1280_v51  ;;  %v1289_v56 = vadd.f32 1.0, %v1568_v44  ;;  %v1272_v50 = vmul.f32 1.442695, %v1260_v22  ;;  %v1292_v19 = vmul.f32 -0.5, %v1568_v44 }
 0x396   :  { %1573 = vlog2.f32 %v1298_v38  ;;  %v1307_v45 = vadd.f32 1.0, %v2100_v21  ;;  %v1262_v47 = vsub.f32 0.0, %v1254_v46  ;;  %v1284_v43 = vadd.f32 1.0, %v1283_v30 }
 0x397   :  { %1575 = vlog2.f32 %v1289_v56  ;;  %v1286_v39 = vand.u32 2147483647, %v1564_v58  ;;  %v1310_v1 = vmul.f32 -0.5, %v2100_v21  ;;  %v1274_v11 = vmul.f32 1.442695, %v1261_v10 }
 0x398   :  { %1577 = vlog2.f32 %v1307_v45  ;;  %v1302_v60 = vadd.f32 1.0, %v1301_v41  ;;  %v1276_v52 = vmul.f32 1.442695, %v1262_v47  ;;  %v1263_v2 = vsub.f32 0.0, %v1255_v48 }
 0x399   :  { %1579 = vpow2.f32 %v1272_v50  ;;  %v1304_v4 = vand.u32 2147483647, %v1566_v28  ;;  %v1293_v13 = vadd.f32 1.0, %v1292_v19  ;;  %v1295_v53 = vand.u32 2147483647, %v1568_v44 }
 0x39a   :  { %1581 = vpow2.f32 %v1274_v11  ;;  %v1278_v15 = vmul.f32 1.442695, %v1263_v2  ;;  %v1285_v54 = vmul.f32 %v1564_v58, %v1284_v43  ;;  %vm1287_vm1 = vcmp.lt.f32.partialorder %v1286_v39, 0.0004427343 }
 0x39b   :  { %1583 = vpow2.f32 %v1276_v52  ;;  %v1311_v7 = vadd.f32 1.0, %v1310_v1  ;;  %v1303_v5 = vmul.f32 %v1566_v28, %v1302_v60  ;;  %v1313_v12 = vand.u32 2147483647, %v2100_v21 }
 0x39c   :  { %1585 = vpow2.f32 %v1278_v15  ;;  %vm1305_vm2 = vcmp.lt.f32.partialorder %v1304_v4, 0.0004427343  ;;  %v1294_v49 = vmul.f32 %v1568_v44, %v1293_v13  ;;  %vm1296_vm3 = vcmp.lt.f32.partialorder %v1295_v53, 0.0004427343 }
 0x39d   :  { %v1312_v32 = vmul.f32 %v2100_v21, %v1311_v7  ;;  %v1243_v58 = vmax.f32 %v2090_v14, 0.0  ;;  %vm1314_vm4 = vcmp.lt.f32.partialorder %v1313_v12, 0.0004427343  ;;  %v1380_v51 = vunpack.c.0.s8 %v1379_v62  ;;  %v2155_v21 = vld [vmem:[#allocation5_spill] sm:$0xff] }
 0x39e   :  { %v1244_v13 = vmax.f32 %v2095_v26, 0.0  ;;  %v1245_v12 = vmax.f32 %v2098_v59, 0.0 }
 0x39f   :  { %v1572_v6 = vpop.eup %1571  ;;  %v1383_v41 = vsub.s32 %v1380_v51, %v2155_v21 }
 0x3a0   :  { %v1574_v16 = vpop.eup %1573  ;;  %v1282_v17 = vmul.f32 0.6931472, %v1572_v6 }
 0x3a1   :  { %v1576_v63 = vpop.eup %1575  ;;  %v1300_v8 = vmul.f32 0.6931472, %v1574_v16 }
 0x3a2   :  { %v1288_v40 = vsel %vm1287_vm1, %v1285_v54, %v1282_v17  ;;  %v1291_v9 = vmul.f32 0.6931472, %v1576_v63  ;;  %v1578_v23 = vpop.eup %1577 }
 0x3a3   :  { %v1352_v20 = vadd.f32 %v1288_v40, %v1240_v3  ;;  %v1306_v33 = vsel %vm1305_vm2, %v1303_v5, %v1300_v8  ;;  %v1309_v31 = vmul.f32 0.6931472, %v1578_v23  ;;  %v1580_v35 = vpop.eup %1579 }
 0x3a4   :  { %v1354_v34 = vadd.f32 %v1306_v33, %v1242_v0  ;;  %v1297_v27 = vsel %vm1296_vm3, %v1294_v49, %v1291_v9  ;;  %v1316_v28 = vadd.f32 1.0, %v1580_v35  ;;  %v1582_v56 = vpop.eup %1581  ;;  %v1319_v19 = vmul.f32 -0.5, %v1580_v35 }
 0x3a5   :  { %v1360_v36 = vmul.f32 100.0, %v1352_v20  ;;  %v1353_v18 = vadd.f32 %v1297_v27, %v1241_v25  ;;  %v1315_v61 = vsel %vm1314_vm4, %v1312_v32, %v1309_v31  ;;  %v1584_v24 = vpop.eup %1583  ;;  %v1325_v45 = vadd.f32 1.0, %v1582_v56 }
 0x3a6   :  { %v1362_v55 = vmul.f32 100.0, %v1354_v34  ;;  %v1355_v38 = vadd.f32 %v1315_v61, %v1243_v58  ;;  %1587 = vlog2.f32 %v1316_v28  ;;  %v1334_v30 = vadd.f32 1.0, %v1584_v24  ;;  %v1586_v50 = vpop.eup %1585 }
 0x3a7   :  { %v1361_v44 = vmul.f32 100.0, %v1353_v18  ;;  %1589 = vlog2.f32 %v1325_v45  ;;  %v1343_v14 = vadd.f32 1.0, %v1586_v50  ;;  %v1328_v10 = vmul.f32 -0.5, %v1582_v56 }
 0x3a8   :  { %v1363_v29 = vmul.f32 100.0, %v1355_v38  ;;  %1591 = vlog2.f32 %v1334_v30  ;;  %v1320_v43 = vadd.f32 1.0, %v1319_v19  ;;  %v1337_v39 = vmul.f32 -0.5, %v1584_v24 }
 0x3a9   :  { %v1376_v22 = vcombine.low %v1360_v36, %v1361_v44  ;;  %1593 = vlog2.f32 %v1343_v14  ;;  %v1322_v1 = vand.u32 2147483647, %v1580_v35  ;;  %v1346_v11 = vmul.f32 -0.5, %v1586_v50 }
 0x3aa   :  { %v1377_v46 = vcombine.low %v1362_v55, %v1363_v29  ;;  %v1329_v2 = vadd.f32 1.0, %v1328_v10  ;;  %v1321_v62 = vmul.f32 %v1580_v35, %v1320_v43  ;;  %v1338_v3 = vadd.f32 1.0, %v1337_v39 }
 0x3ab   :  { %v1384_v47 = vrot.slane %v1376_v22, %v1383_v41  ;;  %v1331_v4 = vand.u32 2147483647, %v1582_v56  ;;  %vm1323_vm5 = vcmp.lt.f32.partialorder %v1322_v1, 0.0004427343  ;;  %v1340_v6 = vand.u32 2147483647, %v1584_v24 }
 0x3ac   :  { %v1391_v48 = vrot.slane %v1377_v46, %v1383_v41  ;;  %v1347_v0 = vadd.f32 1.0, %v1346_v11  ;;  %v1330_v7 = vmul.f32 %v1582_v56, %v1329_v2  ;;  %v1349_v63 = vand.u32 2147483647, %v1586_v50 }
 0x3ad   :  { %v1339_v5 = vmul.f32 %v1584_v24, %v1338_v3  ;;  %vm1332_vm6 = vcmp.lt.f32.partialorder %v1331_v4, 0.0004427343  ;;  %v1246_v9 = vmax.f32 %v2102_v42, 0.0  ;;  %vm1341_vm7 = vcmp.lt.f32.partialorder %v1340_v6, 0.0004427343 }
 0x3ae   :  { %v1392_v60 = vcombine.low %v1384_v47, %v1391_v48  ;;  %v1348_v49 = vmul.f32 %v1586_v50, %v1347_v0  ;;  %v1247_v27 = vmax.f32 %v2106_v37, 0.0  ;;  %vm1350_vm8 = vcmp.lt.f32.partialorder %v1349_v63, 0.0004427343 }
 0x3b0   :  { %v1588_v52 = vpop.eup %1587  ;;  %1412 = vst [vmem:[#allocation2] sm:$0xff] %v1392_v60 }
 0x3b1   :  { %v1318_v57 = vmul.f32 0.6931472, %v1588_v52  ;;  %v1590_v53 = vpop.eup %1589 }
 0x3b2   :  { %v1592_v16 = vpop.eup %1591  ;;  %v1327_v54 = vmul.f32 0.6931472, %v1590_v53 }
 0x3b3   :  { %v1324_v15 = vsel %vm1323_vm5, %v1321_v62, %v1318_v57  ;;  %v1336_v8 = vmul.f32 0.6931472, %v1592_v16  ;;  %v1594_v40 = vpop.eup %1593 }
 0x3b4   :  { %v1356_v17 = vadd.f32 %v1324_v15, %v1244_v13  ;;  %v1333_v26 = vsel %vm1332_vm6, %v1330_v7, %v1327_v54  ;;  %v1345_v25 = vmul.f32 0.6931472, %v1594_v40 }
 0x3b5   :  { %v1342_v20 = vsel %vm1341_vm7, %v1339_v5, %v1336_v8  ;;  %v1357_v33 = vadd.f32 %v1333_v26, %v1245_v12 }
 0x3b6   :  { %v1364_v23 = vmul.f32 100.0, %v1356_v17  ;;  %v1358_v34 = vadd.f32 %v1342_v20, %v1246_v9  ;;  %v1351_v32 = vsel %vm1350_vm8, %v1348_v49, %v1345_v25 }
 0x3b7   :  { %v1365_v31 = vmul.f32 100.0, %v1357_v33  ;;  %v1359_v36 = vadd.f32 %v1351_v32, %v1247_v27 }
 0x3b8   :  { %v1366_v35 = vmul.f32 100.0, %v1358_v34 }
 0x3b9   :  { %v1393_v59 = vcombine.low %v1364_v23, %v1365_v31  ;;  %v1367_v18 = vmul.f32 100.0, %v1359_v36 }
 0x3bb   :  { %v1394_v58 = vcombine.low %v1366_v35, %v1367_v18  ;;  %v1401_v61 = vrot.slane %v1393_v59, %v1383_v41 }
 0x3bd   :  { %v1408_v42 = vrot.slane %v1394_v58, %v1383_v41 }
 0x3bf   :  { %v1409_v28 = vcombine.low %v1401_v61, %v1408_v42 }
 0x3c1   :  { %1413 = vst [vmem:[#allocation2 + $0x8] sm:$0xff] %v1409_v28 }
 0x3c2   :  { %1606 = shalt.err (!%p1603_p4)
}
 0x3c3   :  { %s1607_s10 = scalar_lea.hbm %s2143_s9, 256 }
 0x3c4   :  { %p1608_p5 = scmp.ne.s32.totalorder %s2143_s9, %s1607_s10  ;;  %p1611_p6 = scmp.lt.u32.totalorder %s1607_s10, %s2143_s9 }
 0x3c6   :  { %p1613_p7 = pnand %p1611_p6, %p1608_p5 }
 0x3c8   :  { %1616 = shalt.err (!%p1613_p7)
}
 0x3c9   :  { %1423 = dma.vmem_to_hbm [thread:$0]  %s1421_s27, 256, %s2143_s9, [#allocation3]  }
 0x3ca   :  { %1617 = dma.done.wait [#allocation3], 256  }
 0x3cb   :  { %1618 = vsyncadd [#allocation3], 4294967040 }
 0x3cc   :  { %1427 = vsyncpa [#allocation3], 1 }

</bundles_post_ra>
